<compile_context>
chip_gen: v5e
topology: v5e:2x2
jax: 0.10.0
libtpu: 0.0.40
codegen_flags: <defaults>
</compile_context>

<pallas_src>
import jax
import jax.numpy as jnp
from jax.experimental import pallas as pl
from jax.experimental.pallas import tpu as pltpu


# ----------------------------------------------------------------------------
# Kernel 1: GraphConv #1 (A @ (x@W1r) form) + fused GATv2 projections
# ----------------------------------------------------------------------------
def _conv1_proj_kernel(a_ref, xw1r_ref, xw1s_ref, b1_ref, wp_ref, bp_ref,
                       xl_ref, xr_ref, hres_ref):
    f32, bf16 = jnp.float32, jnp.bfloat16
    H = xl_ref.shape[1]

    # GraphConv #1: relu(lin_rel(A @ x) + lin_root(x)) == relu(A@(x@W1r) + x@W1s + b)
    agg = jnp.dot(a_ref[...], xw1r_ref[...], preferred_element_type=f32)
    h = jnp.maximum(agg + xw1s_ref[...] + b1_ref[...], 0.0)
    # F.dropout(p=dropout_gat, training=False) -> identity

    # Fused GATv2 projections: [Wl | Wr | Wres] in one MXU pass.
    proj = (jnp.dot(h.astype(bf16), wp_ref[...], preferred_element_type=f32)
            + bp_ref[...])
    xl_ref[...] = proj[:, :H]
    xr_ref[...] = proj[:, H:2 * H]
    hres_ref[...] = proj[:, 2 * H:]


# ----------------------------------------------------------------------------
# Kernel 2: GATv2 attention, streamed over key tiles, online softmax,
#           block-sparse tile skipping via a scalar-prefetched occupancy table.
# ----------------------------------------------------------------------------
def _make_gatv2_kernel(n_chan):
    def kernel(occ_ref, xr_ref, hres_ref, xlt_ref, xlv_ref, a_ref,
               att08_ref, att02r_ref, att02c_ref, bgat_ref,
               g_ref, m_sc, l_sc, acc_sc):
        f32, bf16 = jnp.float32, jnp.bfloat16
        q = pl.program_id(0)
        k = pl.program_id(1)
        nk = pl.num_programs(1)
        tq, H = acc_sc.shape
        tk = a_ref.shape[1]

        @pl.when(k == 0)
        def _():
            m_sc[...] = jnp.full_like(m_sc, -1e30)
            l_sc[...] = jnp.zeros_like(l_sc)
            acc_sc[...] = jnp.zeros_like(acc_sc)

        # Skip all compute for tiles with no edges and no diagonal entries.
        @pl.when(occ_ref[q * nk + k] > 0)
        def _():
            xr = xr_ref[...]                      # (tq, H) f32 queries
            xlt = xlt_ref[...]                    # (H, tk) f32 keys (transposed)
            att08 = att08_ref[...]                # (1, H)  f32 (0.8 * att)

            # leaky_relu(z, 0.2) = 0.2*z + 0.8*relu(z)
            #   e_ij = 0.2*(sR_i + sL_j) + 0.8*sum_c att_c*relu(xr_ic + xl_jc)
            sr = jnp.sum(xr * att02r_ref[...], axis=1, keepdims=True)   # (tq, 1)
            sl = jnp.sum(xlt * att02c_ref[...], axis=0, keepdims=True)  # (1, tk)
            e = sr + sl                                                 # (tq, tk)

            # relu part, one channel at a time: live temps stay (tq, tk),
            # no 3-D broadcast tensor, no spills.
            for c in range(n_chan):
                z = jnp.maximum(xr[:, c:c + 1] + xlt[c:c + 1, :], 0.0)
                e = e + att08[:, c:c + 1] * z

            # Mask = edge (j -> i) or self-loop (add_self_loops=True), in-kernel.
            rows = q * tq + jax.lax.broadcasted_iota(jnp.int32, (tq, tk), 0)
            cols = k * tk + jax.lax.broadcasted_iota(jnp.int32, (tq, tk), 1)
            mask = (a_ref[...] > 0) | (rows == cols)
            e = jnp.where(mask, e, -1e30)

            # Online softmax with deferred normalization.
            m_prev = m_sc[...]
            m_new = jnp.maximum(m_prev, jnp.max(e, axis=-1, keepdims=True))
            corr = jnp.exp(m_prev - m_new)
            p = jnp.where(mask, jnp.exp(e - m_new), 0.0)
            l_sc[...] = corr * l_sc[...] + jnp.sum(p, axis=-1, keepdims=True)
            acc_sc[...] = corr * acc_sc[...] + jnp.dot(
                p.astype(bf16), xlv_ref[...], preferred_element_type=f32)
            m_sc[...] = m_new

        @pl.when(k == nk - 1)
        def _():
            # attention dropout (p=dropout_forward) is identity in eval mode.
            inv_l = pl.reciprocal(l_sc[...], approx=True)   # EUP, off the VPU
            g = acc_sc[...] * inv_l + hres_ref[...] + bgat_ref[...]
            g_ref[...] = jnp.maximum(g, 0.0).astype(g_ref.dtype)

    return kernel


# ----------------------------------------------------------------------------
# Kernel 3: GraphConv #2 + global_add_pool accumulation + MLP head
# ----------------------------------------------------------------------------
def _conv2_pool_mlp_kernel(a_ref, g_ref, pool_ref, w2r_ref, w2s_ref, b2_ref,
                           wfc1_ref, bfc1_ref, wfc2_ref, bfc2_ref,
                           out_ref, pooled_sc):
    f32, bf16 = jnp.float32, jnp.bfloat16
    i = pl.program_id(0)
    tq = a_ref.shape[0]

    @pl.when(i == 0)
    def _():
        pooled_sc[...] = jnp.zeros_like(pooled_sc)

    g_full = g_ref[...]                                        # (Np, H) bf16
    g_tile = g_ref[pl.ds(pl.multiple_of(i * tq, tq), tq), :]   # (tq, H) bf16

    # GraphConv #2: relu((A@g)@W2r + g@W2s + b2) -- two matmuls, no concat copy.
    agg2 = jnp.dot(a_ref[...], g_full, preferred_element_type=f32)
    h2 = jnp.maximum(
        jnp.dot(agg2.astype(bf16), w2r_ref[...], preferred_element_type=f32)
        + jnp.dot(g_tile, w2s_ref[...], preferred_element_type=f32)
        + b2_ref[...], 0.0)

    # global_add_pool accumulated across row tiles.
    pooled_sc[...] += jnp.dot(pool_ref[...], h2.astype(bf16),
                              preferred_element_type=f32)

    @pl.when(i == pl.num_programs(0) - 1)
    def _():
        f1 = jnp.maximum(
            jnp.dot(pooled_sc[...].astype(bf16), wfc1_ref[...],
                    preferred_element_type=f32) + bfc1_ref[...], 0.0)
        # F.dropout(p=dropout_forward, training=False) -> identity
        out_ref[...] = (jnp.dot(f1.astype(bf16), wfc2_ref[...],
                                preferred_element_type=f32) + bfc2_ref[...])


# ----------------------------------------------------------------------------
# Glue: padding helpers, parameter init, pallas_call wrappers
# ----------------------------------------------------------------------------
def _round_up(v, m):
    return ((v + m - 1) // m) * m


def _pad2(w, rows, cols, dtype):
    out = jnp.zeros((rows, cols), jnp.float32)
    out = out.at[:w.shape[0], :w.shape[1]].set(w.astype(jnp.float32))
    return out.astype(dtype)


def _vmem_limit_bytes():
    # v5e/v6e have 128 MiB physical VMEM -> raise the scoped limit; v7x has
    # 64 MiB per TensorCore -> stay conservative.
    try:
        kind = jax.devices()[0].device_kind.lower()
    except Exception:
        return 48 * 1024 * 1024
    if any(t in kind for t in ("v2", "v3", "v4", "v5", "v6")):
        return 96 * 1024 * 1024
    return 48 * 1024 * 1024


def init_params(key, in_c, hid, out_c, heads=1):
    ks = jax.random.split(key, 16)

    def lin_w(k, fan_in, fan_out):
        s = 1.0 / jnp.sqrt(jnp.float32(fan_in))
        return jax.random.uniform(k, (fan_in, fan_out), jnp.float32, -s, s)

    def lin_b(k, fan_in, fan_out):
        s = 1.0 / jnp.sqrt(jnp.float32(fan_in))
        return jax.random.uniform(k, (1, fan_out), jnp.float32, -s, s)

    hh = hid * heads
    return {
        # GraphConv1 (in_c -> hid): lin_rel (bias), lin_root (no bias)
        "w1r": lin_w(ks[0], in_c, hid), "b1r": lin_b(ks[1], in_c, hid),
        "w1s": lin_w(ks[2], in_c, hid),
        # GATv2 (hid -> hid, heads=1)
        "wl": lin_w(ks[3], hid, hh), "bl": lin_b(ks[4], hid, hh),
        "wr": lin_w(ks[5], hid, hh), "br": lin_b(ks[6], hid, hh),
        "att": jax.random.normal(ks[7], (1, hh), jnp.float32) * 0.1,
        "wres": lin_w(ks[8], hid, hh),
        "bgat": jnp.zeros((1, hh), jnp.float32),
        # GraphConv2 (hid*heads -> hid)
        "w2r": lin_w(ks[9], hh, hid), "b2r": lin_b(ks[10], hh, hid),
        "w2s": lin_w(ks[11], hh, hid),
        # fc1, fc2
        "wfc1": lin_w(ks[12], hid, hid), "bfc1": lin_b(ks[13], hid, hid),
        "wfc2": lin_w(ks[14], hid, out_c), "bfc2": lin_b(ks[15], hid, out_c),
    }


def carate_forward(x, edge_index, batch, params, num_graphs, *, tile=128):
    f32, bf16 = jnp.float32, jnp.bfloat16
    N, in_c = x.shape
    hid = params["w1r"].shape[1]
    out_c = params["wfc2"].shape[1]

    H = _round_up(hid, 128)                  # lane / MXU friendly hidden
    n_pad = _round_up(max(N, tile), tile)    # node dim, multiple of the row tile
    b_pad = _round_up(max(num_graphs, 8), 8)
    out_p = _round_up(out_c, 128)            # lane-dense final store
    nq = n_pad // tile
    n2 = n_pad * n_pad
    vmem = _vmem_limit_bytes()

    src, dst = edge_index[0], edge_index[1]

    # Dense adjacency built directly in bf16 (exact for integer edge counts <256).
    a = jnp.zeros((n_pad, n_pad), bf16).at[dst, src].add(1.0)

    # Block-occupancy table for GATv2 tile skipping: any edge OR the diagonal.
    occ = jnp.zeros((nq, nq), jnp.int32).at[dst // tile, src // tile].max(1)
    occ = jnp.maximum(occ, jnp.eye(nq, dtype=jnp.int32)).reshape(-1)

    batch_p = jnp.full((n_pad,), -1, jnp.int32).at[:N].set(batch.astype(jnp.int32))
    pool = (jnp.arange(b_pad, dtype=jnp.int32)[:, None] == batch_p[None, :]
            ).astype(bf16)

    P = params
    # GraphConv1 refactor A@(x@W1r): the narrow in_c-deep matmuls are tiny
    # wrapper-side XLA ops, so kernel 1's big MXU pass is lane-dense in H.
    xw1r = jnp.zeros((n_pad, H), f32).at[:N, :hid].set(
        jnp.dot(x, P["w1r"])).astype(bf16)
    xw1s = jnp.zeros((n_pad, H), f32).at[:N, :hid].set(jnp.dot(x, P["w1s"]))
    b1_p = _pad2(P["b1r"], 1, H, f32)

    # Fused GATv2 projection weights (weights bf16, biases f32).
    wproj_b = jnp.concatenate([_pad2(P["wl"], H, H, bf16),
                               _pad2(P["wr"], H, H, bf16),
                               _pad2(P["wres"], H, H, bf16)], axis=1)   # (H, 3H)
    bproj_p = jnp.concatenate([_pad2(P["bl"], 1, H, f32),
                               _pad2(P["br"], 1, H, f32),
                               jnp.zeros((1, H), f32)], axis=1)         # (1, 3H)
    att_p = _pad2(P["att"], 1, H, f32)
    att08 = 0.8 * att_p                      # relu part of leaky_relu split
    att02r = 0.2 * att_p                     # linear part (row form)
    att02c = att02r.reshape(H, 1)            # linear part (column form)
    bgat_p = _pad2(P["bgat"], 1, H, f32)
    w2r_b = _pad2(P["w2r"], H, H, bf16)
    w2s_b = _pad2(P["w2s"], H, H, bf16)
    b2_p = _pad2(P["b2r"], 1, H, f32)
    wfc1_b = _pad2(P["wfc1"], H, H, bf16)
    bfc1_p = _pad2(P["bfc1"], 1, H, f32)
    wfc2_b = _pad2(P["wfc2"], H, out_p, bf16)
    bfc2_p = _pad2(P["bfc2"], 1, out_p, f32)

    # ---- kernel 1: GraphConv1 + fused GATv2 projections ----
    xl, xr, hres = pl.pallas_call(
        _conv1_proj_kernel,
        grid_spec=pltpu.PrefetchScalarGridSpec(
            num_scalar_prefetch=0,
            grid=(nq,),
            in_specs=[
                pl.BlockSpec((tile, n_pad), lambda i: (i, 0)),   # A row slab
                pl.BlockSpec((n_pad, H), lambda i: (0, 0)),      # x@W1r (resident)
                pl.BlockSpec((tile, H), lambda i: (i, 0)),       # x@W1s tile
                pl.BlockSpec((1, H), lambda i: (0, 0)),
                pl.BlockSpec((H, 3 * H), lambda i: (0, 0)),
                pl.BlockSpec((1, 3 * H), lambda i: (0, 0)),
            ],
            out_specs=(
                pl.BlockSpec((tile, H), lambda i: (i, 0)),
                pl.BlockSpec((tile, H), lambda i: (i, 0)),
                pl.BlockSpec((tile, H), lambda i: (i, 0)),
            ),
        ),
        out_shape=(
            jax.ShapeDtypeStruct((n_pad, H), f32),
            jax.ShapeDtypeStruct((n_pad, H), f32),
            jax.ShapeDtypeStruct((n_pad, H), f32),
        ),
        compiler_params=pltpu.CompilerParams(
            dimension_semantics=("parallel",), vmem_limit_bytes=vmem),
        cost_estimate=pl.CostEstimate(
            flops=2 * n2 * H + 6 * n_pad * H * H,
            transcendentals=0,
            bytes_accessed=2 * n2 + 16 * n_pad * H),
    )(a, xw1r, xw1s, b1_p, wproj_b, bproj_p)

    # Tiny XLA glue between kernels: transposed keys (f32) + bf16 values.
    xlt = jnp.transpose(xl)          # (H, n_pad) f32 for score computation
    xlv = xl.astype(bf16)            # (n_pad, H) bf16 for the MXU value matmul

    # ---- kernel 2: block-sparse streaming GATv2 attention ----
    g = pl.pallas_call(
        _make_gatv2_kernel(min(hid, H)),
        grid_spec=pltpu.PrefetchScalarGridSpec(
            num_scalar_prefetch=1,                              # occ table -> SMEM
            grid=(nq, nq),
            in_specs=[
                pl.BlockSpec((tile, H), lambda q, k, occ: (q, 0)),     # xr
                pl.BlockSpec((tile, H), lambda q, k, occ: (q, 0)),     # residual
                pl.BlockSpec((H, tile), lambda q, k, occ: (0, k)),     # xl^T keys
                pl.BlockSpec((tile, H), lambda q, k, occ: (k, 0)),     # xl values
                pl.BlockSpec((tile, tile), lambda q, k, occ: (q, k)),  # A tile
                pl.BlockSpec((1, H), lambda q, k, occ: (0, 0)),        # 0.8*att
                pl.BlockSpec((1, H), lambda q, k, occ: (0, 0)),        # 0.2*att row
                pl.BlockSpec((H, 1), lambda q, k, occ: (0, 0)),        # 0.2*att col
                pl.BlockSpec((1, H), lambda q, k, occ: (0, 0)),        # GAT bias
            ],
            out_specs=pl.BlockSpec((tile, H), lambda q, k, occ: (q, 0)),
            scratch_shapes=[
                pltpu.VMEM((tile, 1), jnp.float32),   # running max
                pltpu.VMEM((tile, 1), jnp.float32),   # running denom
                pltpu.VMEM((tile, H), jnp.float32),   # unnormalized accumulator
            ],
        ),
        out_shape=jax.ShapeDtypeStruct((n_pad, H), bf16),
        compiler_params=pltpu.CompilerParams(
            dimension_semantics=("parallel", "arbitrary"), vmem_limit_bytes=vmem),
        cost_estimate=pl.CostEstimate(
            flops=8 * n2 * H, transcendentals=n2,
            bytes_accessed=2 * n2 + 6 * (n2 // tile) * H + 8 * n_pad * H),
    )(occ, xr, hres, xlt, xlv, a, att08, att02r, att02c, bgat_p)

    # ---- kernel 3: GraphConv2 + pooling + MLP head ----
    out_full = pl.pallas_call(
        _conv2_pool_mlp_kernel,
        grid_spec=pltpu.PrefetchScalarGridSpec(
            num_scalar_prefetch=0,
            grid=(nq,),
            in_specs=[
                pl.BlockSpec((tile, n_pad), lambda i: (i, 0)),   # A row slab
                pl.BlockSpec((n_pad, H), lambda i: (0, 0)),      # g (resident)
                pl.BlockSpec((b_pad, tile), lambda i: (0, i)),   # pool columns
                pl.BlockSpec((H, H), lambda i: (0, 0)),          # w2 rel
                pl.BlockSpec((H, H), lambda i: (0, 0)),          # w2 root
                pl.BlockSpec((1, H), lambda i: (0, 0)),
                pl.BlockSpec((H, H), lambda i: (0, 0)),
                pl.BlockSpec((1, H), lambda i: (0, 0)),
                pl.BlockSpec((H, out_p), lambda i: (0, 0)),
                pl.BlockSpec((1, out_p), lambda i: (0, 0)),
            ],
            out_specs=pl.BlockSpec((b_pad, out_p), lambda i: (0, 0)),
            scratch_shapes=[pltpu.VMEM((b_pad, H), jnp.float32)],
        ),
        out_shape=jax.ShapeDtypeStruct((b_pad, out_p), f32),
        compiler_params=pltpu.CompilerParams(
            dimension_semantics=("arbitrary",), vmem_limit_bytes=vmem),
        cost_estimate=pl.CostEstimate(
            flops=2 * n2 * H + 4 * n_pad * H * H + 2 * b_pad * n_pad * H,
            transcendentals=0,
            bytes_accessed=2 * n2 + 4 * n_pad * H + 4 * b_pad * out_p),
    )(a, g, pool, w2r_b, w2s_b, b2_p, wfc1_b, bfc1_p, wfc2_b, bfc2_p)

    out = out_full[:num_graphs, :out_c]
    return jnp.squeeze(out, -1) if out_c == 1 else out        # x.squeeze(-1)


# ----------------------------------------------------------------------------
# Pure-JAX reference (same math, same bf16 matmul-operand casts)
# ----------------------------------------------------------------------------
def carate_reference(x, edge_index, batch, params, num_graphs):
    f32, bf16 = jnp.float32, jnp.bfloat16
    N = x.shape[0]
    P = params

    def mm(u, w):
        return jnp.dot(u.astype(bf16), w.astype(bf16), preferred_element_type=f32)

    a = jnp.zeros((N, N), f32).at[edge_index[1], edge_index[0]].add(1.0)
    mask = (a > 0) | jnp.eye(N, dtype=bool)
    pool = (batch[None, :] == jnp.arange(num_graphs, dtype=batch.dtype)[:, None])

    xw1r = jnp.dot(x, P["w1r"])
    h = jnp.maximum(
        jnp.dot(a.astype(bf16), xw1r.astype(bf16), preferred_element_type=f32)
        + jnp.dot(x, P["w1s"]) + P["b1r"], 0.0)
    xl = mm(h, P["wl"]) + P["bl"]
    xr = mm(h, P["wr"]) + P["br"]
    hres = mm(h, P["wres"])
    z = xr[:, None, :] + xl[None, :, :]
    z = jnp.where(z > 0, z, 0.2 * z)
    e = jnp.sum(z * P["att"][None, :, :], axis=-1)
    e = jnp.where(mask, e, -1e30)
    p = jnp.where(mask, jnp.exp(e - jnp.max(e, axis=-1, keepdims=True)), 0.0)
    alpha = p / jnp.sum(p, axis=-1, keepdims=True)
    g = jnp.maximum(mm(alpha, xl) + hres + P["bgat"], 0.0)
    agg2 = jnp.dot(a.astype(bf16), g.astype(bf16), preferred_element_type=f32)
    h2 = jnp.maximum(mm(agg2, P["w2r"]) + mm(g, P["w2s"]) + P["b2r"], 0.0)
    pooled = jnp.dot(pool.astype(bf16), h2.astype(bf16), preferred_element_type=f32)
    f1 = jnp.maximum(mm(pooled, P["wfc1"]) + P["bfc1"], 0.0)
    out = mm(f1, P["wfc2"]) + P["bfc2"]
    return jnp.squeeze(out, -1) if out.shape[-1] == 1 else out


if __name__ == "__main__":
    key = jax.random.PRNGKey(0)
    # Small shapes consistent with the module (hidden=128 is lane-exact here;
    # the real model uses hidden_channels=364 -> padded to 384, heads=1, out=1).
    in_c, hid, out_c, heads = 12, 128, 1, 1
    n_per_graph, num_graphs = 80, 3
    N = n_per_graph * num_graphs            # 240 nodes -> padded to 256 (2x2 tiles)

    kx, kp = jax.random.split(key)
    x = jax.random.normal(kx, (N, in_c), jnp.float32)

    # Bidirectional rings inside each of the 3 graphs.
    edges = []
    for gidx in range(num_graphs):
        base = gidx * n_per_graph
        for i in range(n_per_graph):
            j = (i + 1) % n_per_graph
            edges.append((base + i, base + j))
            edges.append((base + j, base + i))
    edge_index = jnp.asarray(edges, dtype=jnp.int32).T          # (2, E)
    batch = jnp.repeat(jnp.arange(num_graphs, dtype=jnp.int32), n_per_graph)

    params = init_params(kp, in_c, hid, out_c, heads)

    out = jax.block_until_ready(
        carate_forward(x, edge_index, batch, params, num_graphs))
    ref = carate_reference(x, edge_index, batch, params, num_graphs)

    assert out.shape == (num_graphs,), out.shape
    rel_err = jnp.max(jnp.abs(out - ref)) / (jnp.max(jnp.abs(ref)) + 1e-6)
    assert bool(rel_err < 2e-2), (out, ref, rel_err)
    print("KERNEL_OK")
</pallas_src>

<mosaic_0001>
module attributes {stable_mosaic.version = 11 : i64} {
  func.func @_conv1_proj_kernel(%arg0: i32, %arg1: memref<128x256xbf16, #tpu.memory_space<vmem>>, %arg2: memref<256x128xbf16, #tpu.memory_space<vmem>>, %arg3: memref<128x128xf32, #tpu.memory_space<vmem>>, %arg4: memref<1x128xf32, #tpu.memory_space<vmem>>, %arg5: memref<128x384xbf16, #tpu.memory_space<vmem>>, %arg6: memref<1x384xf32, #tpu.memory_space<vmem>>, %arg7: memref<128x128xf32, #tpu.memory_space<vmem>>, %arg8: memref<128x128xf32, #tpu.memory_space<vmem>>, %arg9: memref<128x128xf32, #tpu.memory_space<vmem>>) attributes {dimension_semantics = [#tpu.dimension_semantics<parallel>], iteration_bounds = array<i64: 2>, scalar_prefetch = 0 : i64, scratch_operands = 0 : i64, tpu.core_type = #tpu.core_type<tc>, window_params = [{transform_indices = @transform_0, window_bounds = array<i64: 128, 256>}, {pipeline_mode = #tpu.pipeline_mode<synchronous>, transform_indices = @transform_1, window_bounds = array<i64: 256, 128>}, {transform_indices = @transform_2, window_bounds = array<i64: 128, 128>}, {pipeline_mode = #tpu.pipeline_mode<synchronous>, transform_indices = @transform_3, window_bounds = array<i64: 1, 128>}, {pipeline_mode = #tpu.pipeline_mode<synchronous>, transform_indices = @transform_4, window_bounds = array<i64: 128, 384>}, {pipeline_mode = #tpu.pipeline_mode<synchronous>, transform_indices = @transform_5, window_bounds = array<i64: 1, 384>}, {transform_indices = @transform_6, window_bounds = array<i64: 128, 128>}, {transform_indices = @transform_7, window_bounds = array<i64: 128, 128>}, {transform_indices = @transform_8, window_bounds = array<i64: 128, 128>}]} {
    %c0 = arith.constant 0 : index
    %c0_0 = arith.constant 0 : index
    %0 = vector.load %arg1[%c0, %c0_0] : memref<128x256xbf16, #tpu.memory_space<vmem>>, vector<128x256xbf16>
    %c0_1 = arith.constant 0 : index
    %c0_2 = arith.constant 0 : index
    %1 = vector.load %arg2[%c0_1, %c0_2] : memref<256x128xbf16, #tpu.memory_space<vmem>>, vector<256x128xbf16>
    %cst = arith.constant dense<0.000000e+00> : vector<128x128xf32>
    %2 = tpu.matmul %0, %1, %cst {dimension_numbers = #tpu.dot_dimension_numbers<[1], [0], [0], [1], [0, 0, 1, 1], [], []>} : vector<128x256xbf16>, vector<256x128xbf16>, vector<128x128xf32> -> vector<128x128xf32>
    %c0_3 = arith.constant 0 : index
    %c0_4 = arith.constant 0 : index
    %3 = vector.load %arg3[%c0_3, %c0_4] : memref<128x128xf32, #tpu.memory_space<vmem>>, vector<128x128xf32>
    %4 = arith.addf %2, %3 : vector<128x128xf32>
    %c0_5 = arith.constant 0 : index
    %c0_6 = arith.constant 0 : index
    %5 = vector.load %arg4[%c0_5, %c0_6] : memref<1x128xf32, #tpu.memory_space<vmem>>, vector<1x128xf32>
    %6 = vector.broadcast %5 : vector<1x128xf32> to vector<128x128xf32>
    %7 = arith.addf %4, %6 : vector<128x128xf32>
    %cst_7 = arith.constant 0.000000e+00 : f32
    %8 = vector.broadcast %cst_7 : f32 to vector<128x128xf32>
    %9 = arith.maximumf %7, %8 : vector<128x128xf32>
    %10 = arith.truncf %9 : vector<128x128xf32> to vector<128x128xbf16>
    %c0_8 = arith.constant 0 : index
    %c0_9 = arith.constant 0 : index
    %11 = vector.load %arg5[%c0_8, %c0_9] : memref<128x384xbf16, #tpu.memory_space<vmem>>, vector<128x384xbf16>
    %cst_10 = arith.constant dense<0.000000e+00> : vector<128x384xf32>
    %12 = tpu.matmul %10, %11, %cst_10 {dimension_numbers = #tpu.dot_dimension_numbers<[1], [0], [0], [1], [0, 0, 1, 1], [], []>} : vector<128x128xbf16>, vector<128x384xbf16>, vector<128x384xf32> -> vector<128x384xf32>
    %c0_11 = arith.constant 0 : index
    %c0_12 = arith.constant 0 : index
    %13 = vector.load %arg6[%c0_11, %c0_12] : memref<1x384xf32, #tpu.memory_space<vmem>>, vector<1x384xf32>
    %14 = vector.broadcast %13 : vector<1x384xf32> to vector<128x384xf32>
    %15 = arith.addf %12, %14 : vector<128x384xf32>
    %16 = vector.extract_strided_slice %15 {offsets = [0, 0], sizes = [128, 128], strides = [1, 1]} : vector<128x384xf32> to vector<128x128xf32>
    %c0_13 = arith.constant 0 : index
    %c0_14 = arith.constant 0 : index
    %17 = vector.load %arg7[%c0_13, %c0_14] : memref<128x128xf32, #tpu.memory_space<vmem>>, vector<128x128xf32>
    tpu.vector_store %arg7[%c0_13, %c0_14], %16 {strides = array<i32>} : memref<128x128xf32, #tpu.memory_space<vmem>>, vector<128x128xf32>,
    %18 = vector.extract_strided_slice %15 {offsets = [0, 128], sizes = [128, 128], strides = [1, 1]} : vector<128x384xf32> to vector<128x128xf32>
    %c0_15 = arith.constant 0 : index
    %c0_16 = arith.constant 0 : index
    %19 = vector.load %arg8[%c0_15, %c0_16] : memref<128x128xf32, #tpu.memory_space<vmem>>, vector<128x128xf32>
    tpu.vector_store %arg8[%c0_15, %c0_16], %18 {strides = array<i32>} : memref<128x128xf32, #tpu.memory_space<vmem>>, vector<128x128xf32>,
    %20 = vector.extract_strided_slice %15 {offsets = [0, 256], sizes = [128, 128], strides = [1, 1]} : vector<128x384xf32> to vector<128x128xf32>
    %c0_17 = arith.constant 0 : index
    %c0_18 = arith.constant 0 : index
    %21 = vector.load %arg9[%c0_17, %c0_18] : memref<128x128xf32, #tpu.memory_space<vmem>>, vector<128x128xf32>
    tpu.vector_store %arg9[%c0_17, %c0_18], %20 {strides = array<i32>} : memref<128x128xf32, #tpu.memory_space<vmem>>, vector<128x128xf32>,
    return
  }
  func.func @transform_0(%arg0: i32) -> (i32, i32) {
    %c0_i32 = arith.constant 0 : i32
    %c0_i32_0 = arith.constant 0 : i32
    return %arg0, %c0_i32 : i32, i32
  }
  func.func @transform_1(%arg0: i32) -> (i32, i32) {
    %c0_i32 = arith.constant 0 : i32
    %c0_i32_0 = arith.constant 0 : i32
    %c0_i32_1 = arith.constant 0 : i32
    return %c0_i32, %c0_i32_0 : i32, i32
  }
  func.func @transform_2(%arg0: i32) -> (i32, i32) {
    %c0_i32 = arith.constant 0 : i32
    %c0_i32_0 = arith.constant 0 : i32
    return %arg0, %c0_i32 : i32, i32
  }
  func.func @transform_3(%arg0: i32) -> (i32, i32) {
    %c0_i32 = arith.constant 0 : i32
    %c0_i32_0 = arith.constant 0 : i32
    %c0_i32_1 = arith.constant 0 : i32
    return %c0_i32, %c0_i32_0 : i32, i32
  }
  func.func @transform_4(%arg0: i32) -> (i32, i32) {
    %c0_i32 = arith.constant 0 : i32
    %c0_i32_0 = arith.constant 0 : i32
    %c0_i32_1 = arith.constant 0 : i32
    return %c0_i32, %c0_i32_0 : i32, i32
  }
  func.func @transform_5(%arg0: i32) -> (i32, i32) {
    %c0_i32 = arith.constant 0 : i32
    %c0_i32_0 = arith.constant 0 : i32
    %c0_i32_1 = arith.constant 0 : i32
    return %c0_i32, %c0_i32_0 : i32, i32
  }
  func.func @transform_6(%arg0: i32) -> (i32, i32) {
    %c0_i32 = arith.constant 0 : i32
    %c0_i32_0 = arith.constant 0 : i32
    return %arg0, %c0_i32 : i32, i32
  }
  func.func @transform_7(%arg0: i32) -> (i32, i32) {
    %c0_i32 = arith.constant 0 : i32
    %c0_i32_0 = arith.constant 0 : i32
    return %arg0, %c0_i32 : i32, i32
  }
  func.func @transform_8(%arg0: i32) -> (i32, i32) {
    %c0_i32 = arith.constant 0 : i32
    %c0_i32_0 = arith.constant 0 : i32
    return %arg0, %c0_i32 : i32, i32
  }
}

</mosaic_0001>

<bundles_post_ra>
// kernel: tpu_custom_call.1
= control target key start
LH: loop header
LB: loop body
LE: loop exit
PB: predicated region body
PF: predicated region fallthrough
CT: control target
= control target key end

     0   :  { %s2620_s0 = inlined_call_operand.hbm [shape: bf16[256,256], index: 0, kind: input, shape index: {}]   ;;  %s2621_s1 = inlined_call_operand.hbm [shape: bf16[256,128], index: 1, kind: input, shape index: {}]   ;;  %s2622_s2 = inlined_call_operand.hbm [shape: f32[256,128], index: 2, kind: input, shape index: {}]   ;;  %s2623_s3 = inlined_call_operand.vmem [shape: f32[1,128], index: 3, kind: input, shape index: {}]   ;;  %s2624_s4 = inlined_call_operand.hbm [shape: bf16[128,384], index: 4, kind: input, shape index: {}]   ;;  %s2625_s5 = inlined_call_operand.vmem [shape: f32[1,384], index: 5, kind: input, shape index: {}]   ;;  %s2626_s6 = inlined_call_operand.hbm [shape: f32[256,128], index: 6, kind: output, shape index: {0}]   ;;  %s2627_s7 = inlined_call_operand.hbm [shape: f32[256,128], index: 7, kind: output, shape index: {1}]   ;;  %s2628_s8 = inlined_call_operand.hbm [shape: f32[256,128], index: 8, kind: output, shape index: {2}]  }
   0x1   :  { %2640 = sst [smem:[#allocation25_spill]] %s2620_s0 }
   0x2   :  { %2641 = sst [smem:[#allocation26_spill]] %s2621_s1 }
   0x3   :  { %14 = vsyncpa [#allocation3], 0 }
   0x4   :  { %16 = vsyncpa [#allocation3 + $0x1], 0 }
   0x5   :  { %17 = vsyncpa [#allocation6], 0 }
   0x6   :  { %18 = vsyncpa [#allocation4], 0 }
   0x7   :  { %20 = vsyncpa [#allocation4 + $0x1], 0 }
   0x8   :  { %21 = vsyncpa [#allocation11], 0 }
   0x9   :  { %23 = vsyncpa [#allocation11 + $0x1], 0  ;;  %s2149_s27 = smov 0   ;;  %s2151_s28 = smov 0  }
   0xa   :  { %s2153_s29 = smov 0   ;;  %s2155_s30 = smov 0  }
   0xb LB: > { %2642 = sst [smem:[#allocation19_spill]] %s2080_s27  ;;  %s2170_s9 = sadd.s32 4294967295, %s2092_s30   ;;  %s2092_s30 = sphi %s2155_s30, %s2667_s30   ;;  %s2088_s29 = sphi %s2153_s29, %s2669_s29   ;;  %s2084_s28 = sphi %s2151_s28, %s2671_s28   ;;  %s2080_s27 = sphi %s2149_s27, %s2670_s27  }
   0xc   : > { %2643 = sst [smem:[#allocation20_spill]] %s2088_s29  ;;  %s2629_s10 = sadd.s32 4294967294, %s2092_s30  }
   0xd   : > { %p49_p0 = scmp.ne.s32.totalorder %s2084_s28, %s2080_s27  ;;  %p2632_p1 = scmp.eq.s32.totalorder %s2170_s9, 0 }
   0xe   : > { %p183_p2 = scmp.eq.s32.totalorder %s2170_s9, 1  ;;  %p189_p3 = scmp.eq.s32.totalorder %s2629_s10, 1 }
   0xf   : > { %p2181_p4 = por %p2632_p1, %p49_p0  ;;  %p1403_p5 = scmp.ge.s32.totalorder %s2092_s30, 1 }
  0x10   : > { %p2186_p6 = por %p189_p3, %p49_p0  ;;  %p248_p7 = scmp.lt.s32.totalorder %s2092_s30, 3 }
  0x11   : > { %s2647_s1 = sld [smem:[#allocation26_spill]]  ;;  %s2094_s17 = smov [#allocation5]  }
  0x12   : > { %s2645_s12 = scalar_select %p2186_p6, 1, 0 }
  0x13   : > { %p2194_p8 = pnand %p1403_p5, %p248_p7  ;;  %s261_s18 = sshll.u32 %s2094_s17, 4  ;;  %s262_s18 = int_to_ptr.vmem [resolvable:$true] %s261_s18 }
  0x14   : > { %2646 = sst [smem:[#allocation21_spill]] %s2645_s12  ;;  %s2208_s20 = sadd.s32 1, %s2092_s30  }
  0x15   : > { %p1761_p9 = pneg %p2194_p8  ;;  %2650 = sst [smem:[#allocation22_spill]] %s2208_s20 }
  0x16   : > { %s2095_s21 = smov 64   ;;  %s2096_s22 = smov 4  }
  0x17   : > { %s259_s15 = sshll.u32 %s2647_s1, 4  ;;  %p2202_p10 = pnand %p1761_p9, %p2632_p1  ;;  %s260_s15 = int_to_ptr.hbm [resolvable:$true] %s259_s15 }
  0x18   : > { %s33_s23 = ssub.s32 %s2092_s30, %s2208_s20  ;;  %s36_s24 = sadd.s32 1, %s2088_s29 }
  0x19   : > { %1764 = dma.hbm_to_vmem [thread:$0]  (!%p2202_p10), %s260_s15, 2048, %s262_s18, [#allocation6], %s2095_s21, %s2095_s21, %s2096_s22  }
  0x1a   : > { %p34_p12 = scmp.eq.s32.totalorder %s33_s23, 0  ;;  %p43_p13 = scmp.ne.s32.totalorder %s2088_s29, %s2084_s28 }
  0x1b   : > { %p44_p0 = scmp.eq.s32.totalorder %s2092_s30, 0  ;;  %p1787_p3 = scmp.lt.s32.totalorder %s2092_s30, 2 }
  0x1c   : > { %s2220_s25 = scalar_select %p34_p12, %s2088_s29, %s36_s24  }
  0x1d   : > { %p45_p5 = por %p44_p0, %p43_p13  ;;  %p2224_p7 = por %p183_p2, %p43_p13 }
  0x1e   : > { %2651 = sst [smem:[#allocation23_spill]] %s2220_s25  ;;  %s295_s13 = sand.u32 1, %s2092_s30  }
  0x1f   : > { %s2652_s26 = scalar_select %p2224_p7, 1, 0 }
  0x20   : > { %s297_s14 = sand.u32 1, %s2088_s29   ;;  %s2631_s15 = sshll.u32 %s2092_s30, 7 }
  0x21   : > { %2653 = sst [smem:[#allocation24_spill]] %s2652_s26  ;;  %s2230_s17 = sshll.u32 %s297_s14, 7 }
  0x22   : > { %s2654_s0 = sld [smem:[#allocation25_spill]]  ;;  %s299_s23 = scalar_lea.vmem [#allocation2], %s2230_s17 }
  0x23   : > { %s308_s24 = sshll.u32 %s299_s23, 4  ;;  %p2241_p2 = pnand %p1787_p3, %p45_p5  ;;  %s309_s24 = int_to_ptr.vmem [resolvable:$true] %s308_s24 }
  0x24   : > { %s2245_s14 = scalar_lea.sflag [#allocation3], %s295_s13 }
  0x25   : > { %p1868_p12 = pneg %p2241_p2 }
  0x28   : > { %s305_s22 = scalar_lea.hbm %s2654_s0, %s2631_s15 }
  0x29   : > { %s306_s10 = sshll.u32 %s305_s22, 4  ;;  %s1871_s22 = scalar_lea.hbm %s2654_s0, 256  ;;  %s307_s10 = int_to_ptr.hbm [resolvable:$true] %s306_s10 }
  0x2a   : > { %s1864_s25 = sshra.s32 %s307_s10, 4  ;;  %s1865_s25 = int_to_ptr.hbm [resolvable:$true] %s1864_s25 }
  0x2b   : > { %s1866_s29 = scalar_lea.hbm %s1865_s25, 128  ;;  %p1872_p3 = scmp.lt.s32.totalorder %s1865_s25, %s2654_s0 }
  0x2c   : > { %p1867_p9 = scmp.ne.s32.totalorder %s1865_s25, %s1866_s29  ;;  %p1873_p5 = scmp.lt.s32.totalorder %s1871_s22, %s1866_s29 }
  0x2e   : > { %p1869_p13 = pnand %p1868_p12, %p1867_p9  ;;  %p1874_p11 = por %p1873_p5, %p1872_p3 }
  0x30   : > { %p1870_p0 = pneg %p1869_p13 }
  0x32   : > { %p1875_p1 = pnand %p1874_p11, %p1870_p0 }
  0x34   : > { %1878 = shalt.err (!%p1875_p1)
}
  0x35   : > { %s2639_s13 = smov 128   ;;  %s2098_s20 = smov 8  }
  0x36   : > { %1771 = dma.hbm_to_vmem [thread:$0]  (!%p2241_p2), %s307_s10, 2048, %s309_s24, %s2245_s14, %s2639_s13, %s2639_s13, %s2098_s20  }
  0x37   : > { %s2656_s18 = sshll.u32 %s2092_s30, 7  ;;  %s322_s25 = scalar_lea.vmem [#allocation7], %s2230_s17 }
  0x38   : > { %s327_s29 = scalar_lea.hbm %s2622_s2, %s2656_s18  ;;  %s2270_s22 = sshll.u32 %s322_s25, 4  ;;  %s331_s22 = int_to_ptr.vmem [resolvable:$true] %s2270_s22 }
  0x39   : > { %s328_s23 = sshll.u32 %s327_s29, 4  ;;  %s276_s27 = sshll.u32 %s2624_s4, 4  ;;  %s329_s23 = int_to_ptr.hbm [resolvable:$true] %s328_s23  ;;  %s277_s27 = int_to_ptr.hbm [resolvable:$true] %s276_s27 }
  0x3a   : > { %s2099_s26 = smov [#allocation8]   ;;  %s2100_s24 = smov 192  }
  0x3b   : > { %s278_s10 = sshll.u32 %s2099_s26, 4  ;;  %s2101_s13 = smov 12   ;;  %s279_s10 = int_to_ptr.vmem [resolvable:$true] %s278_s10 }
  0x3c   : > { %1767 = dma.hbm_to_vmem [thread:$0]  (!%p2202_p10), %s277_s27, 3072, %s279_s10, [#allocation6], %s2100_s24, %s2100_s24, %s2101_s13  }
  0x3d   : > { %s1924_s17 = sshra.s32 %s329_s23, 4  ;;  %s1931_s0 = scalar_lea.hbm %s2622_s2, 256  ;;  %s1925_s17 = int_to_ptr.hbm [resolvable:$true] %s1924_s17 }
  0x3e   : > { %s1926_s18 = scalar_lea.hbm %s1925_s17, 128  ;;  %p1932_p13 = scmp.lt.s32.totalorder %s1925_s17, %s2622_s2 }
  0x3f   : > { %p1927_p1 = scmp.ne.s32.totalorder %s1925_s17, %s1926_s18  ;;  %p1933_p0 = scmp.lt.s32.totalorder %s1931_s0, %s1926_s18 }
  0x41   : > { %p1929_p11 = pnand %p1927_p1, %p1868_p12  ;;  %p1934_p3 = por %p1933_p0, %p1932_p13 }
  0x43   : > { %p1930_p9 = pneg %p1929_p11 }
  0x45   : > { %p1935_p5 = pnand %p1934_p3, %p1930_p9 }
  0x47   : > { %1938 = shalt.err (!%p1935_p5)
}
  0x48   : > { %s2657_s27 = smov 128   ;;  %342 = sbr.rel (%p2194_p8) target bundleno = 581 (0x245), region = 44 }
  0x49   : > { %1774 = dma.hbm_to_vmem [thread:$0]  (!%p2241_p2), %s329_s23, 2048, %s331_s22, %s2245_s14, %s2657_s27, %s2657_s27, %s2098_s20  }
  0x4a   : > { %s344_s19 = sand.u32 (!%p2194_p8), 1, %s2170_s9   ;;  %s346_s26 = sand.u32 (!%p2194_p8), 1, %s2084_s28  }
  0x4b   : > { %s2299_s13 = sshll.u32 (!%p2194_p8), %s346_s26, 7  ;;  %s345_s1 = scalar_lea.sflag (!%p2194_p8), [#allocation3], %s344_s19 }
  0x4c   : > { %s2304_s25 = scalar_lea.vmem (!%p2194_p8), [#allocation2], %s2299_s13 }
  0x4d   : > { %2055 = dma.done.wait (%p2181_p4), %s345_s1, 2048  }
  0x4e   : > { %2057 = vsyncadd (%p2181_p4), %s345_s1, 4294965248  ;;  %p2658_p8 = scmp.eq.s32.totalorder %s2170_s9, 0 }
  0x50   : > { %2059 = dma.done.wait (%p2658_p8), [#allocation6], 2048   ;;  %p2659_p10 = pmov %p2658_p8 }
  0x51   : > { %s2315_s16 = scalar_lea.vmem [#allocation7], %s2299_s13 }
  0x52   : > { %2061 = vsyncadd (%p2659_p10), [#allocation6], 4294965248 }
  0x53   : > { %2063 = dma.done.wait (%p2181_p4), %s345_s1, 2048  }
  0x54   : > { %2065 = vsyncadd (%p2181_p4), %s345_s1, 4294965248  ;;  %p2660_p2 = pmov %p2658_p8 }
  0x56   : > { %2067 = dma.done.wait (%p2660_p2), [#allocation6], 3072   ;;  %p2661_p12 = pmov %p2660_p2 }
  0x57   : > { %v1683_v0 = vld [vmem:[#allocation5 + $0x38] sm:$0xff]  ;;  %v1682_v1 = vld [vmem:[#allocation5 + $0x30] sm:$0xff]  ;;  %v1681_v2 = vld [vmem:[#allocation5 + $0x28] sm:$0xff]  ;;  %s2411_s23 = scalar_lea.vmem [#allocation12], %s2299_s13  ;;  %s2417_s10 = scalar_lea.vmem [#allocation9], %s2299_s13 }
  0x58   : > { %2069 = vsyncadd (%p2661_p12), [#allocation6], 4294964224  ;;  %1719 = vmatpush.bf16.msra.mxu1 %v1683_v0  ;;  %662 = vmatpush.bf16.msra.mxu0 %v1683_v0  ;;  %v1680_v3 = vld [vmem:[#allocation5 + $0x20] sm:$0xff]  ;;  %v1679_v4 = vld [vmem:[#allocation5 + $0x18] sm:$0xff]  ;;  %s2421_s24 = scalar_lea.vmem [#allocation10], %s2299_s13  ;;  %s1716_s17 = sshll.u32 %s2170_s9, 7 }
  0x59   : > { %1720 = vmatpush.bf16.msra.mxu2 %v1683_v0  ;;  %1721 = vmatpush.bf16.msra.mxu3 %v1683_v0  ;;  %v1678_v5 = vld [vmem:[#allocation5 + $0x10] sm:$0xff]  ;;  %v1677_v6 = vld [vmem:[#allocation5 + $0x8] sm:$0xff]  ;;  %v1676_v7 = vld [vmem:[#allocation5] sm:$0xff]  ;;  %s1206_s15 = scalar_lea.hbm %s2627_s7, %s1716_s17  ;;  %s1207_s0 = sshll.u32 %s2421_s24, 4  ;;  %s2523_s0 = int_to_ptr.vmem [resolvable:$true] %s1207_s0 }
  0x5a   : > { %v1440_v8 = vld [vmem:[%s2304_s25 + $0x20] sm:$0xf]  ;;  %v1665_v9 = vld [vmem:[%s2304_s25 + $0x24] sm:$0xf0]  ;;  %v1691_v12 = vld [vmem:[#allocation5 + $0x78] sm:$0xff]  ;;  %s2514_s12 = sshll.u32 %s1206_s15, 4  ;;  %s1189_s13 = scalar_lea.hbm %s2626_s6, %s1716_s17  ;;  %s1210_s12 = int_to_ptr.hbm [resolvable:$true] %s2514_s12 }
  0x5b   : > { %v1424_v10 = vld [vmem:[%s2304_s25] sm:$0xf]  ;;  %v1661_v11 = vld [vmem:[%s2304_s25 + $0x4] sm:$0xf0]  ;;  %v1441_v13 = vor.u32 %v1665_v9, %v1440_v8  ;;  %v1690_v15 = vld [vmem:[#allocation5 + $0x70] sm:$0xff]  ;;  %s1190_s11 = sshll.u32 %s2417_s10, 4  ;;  %s2535_s11 = int_to_ptr.vmem [resolvable:$true] %s1190_s11 }
  0x5c   : > { %1722 = vmatpush.bf16.msra.mxu1 %v1682_v1  ;;  %663 = vmatpush.bf16.msra.mxu0 %v1682_v1  ;;  %v1425_v14 = vor.u32 %v1661_v11, %v1424_v10  ;;  %v1689_v16 = vld [vmem:[#allocation5 + $0x68] sm:$0xff]  ;;  %v1688_v17 = vld [vmem:[#allocation5 + $0x60] sm:$0xff]  ;;  %v1448_v18 = vld [vmem:[%s2304_s25 + $0x30] sm:$0xf]  ;;  %s2526_s20 = sshll.u32 %s1189_s13, 4  ;;  %s1224_s18 = sshll.u32 %s2411_s23, 4  ;;  %s1193_s20 = int_to_ptr.hbm [resolvable:$true] %s2526_s20  ;;  %s2540_s18 = int_to_ptr.vmem [resolvable:$true] %s1224_s18 }
  0x5d   : > { %1723 = vmatpush.bf16.msra.mxu2 %v1682_v1  ;;  %1724 = vmatpush.bf16.msra.mxu3 %v1682_v1  ;;  %v1667_v19 = vld [vmem:[%s2304_s25 + $0x34] sm:$0xf0]  ;;  %v1432_v20 = vld [vmem:[%s2304_s25 + $0x10] sm:$0xf]  ;;  %v1685_v26 = vld [vmem:[#allocation5 + $0x48] sm:$0xff]  ;;  %s1968_s21 = sshra.s32 %s1210_s12, 4  ;;  %s1969_s21 = int_to_ptr.hbm [resolvable:$true] %s1968_s21 }
  0x5e   : > { %v1663_v21 = vld [vmem:[%s2304_s25 + $0x14] sm:$0xf0]  ;;  %v1449_v23 = vor.u32 %v1667_v19, %v1448_v18  ;;  %v1686_v25 = vld [vmem:[#allocation5 + $0x50] sm:$0xff]  ;;  %v1684_v27 = vld [vmem:[#allocation5 + $0x40] sm:$0xff]  ;;  %s1970_s15 = scalar_lea.hbm %s1969_s21, 128  ;;  %p1975_p9 = scmp.lt.s32.totalorder %s1969_s21, %s2627_s7 }
  0x5f   : > { %v1687_v22 = vld [vmem:[#allocation5 + $0x58] sm:$0xff]  ;;  %v1433_v24 = vor.u32 %v1663_v21, %v1432_v20  ;;  %v1660_v28 = vld [vmem:[%s2304_s25 + $0x4] sm:$0xf]  ;;  %v1426_v29 = vld [vmem:[%s2304_s25 + $0x8] sm:$0xf0]  ;;  %p1971_p4 = scmp.ne.s32.totalorder %s1969_s21, %s1970_s15 }
  0x60   : > { %1725 = vmatpush.bf16.msra.mxu1 %v1681_v2  ;;  %664 = vmatpush.bf16.msra.mxu0 %v1681_v2  ;;  %v1429_v30 = vor.u32 %v1660_v28, %v1426_v29  ;;  %v1456_v31 = vld [vmem:[%s2304_s25 + $0x40] sm:$0xf]  ;;  %v1669_v32 = vld [vmem:[%s2304_s25 + $0x44] sm:$0xf0]  ;;  %v1662_v34 = vld [vmem:[%s2304_s25 + $0x14] sm:$0xf] }
  0x61   : > { %1726 = vmatpush.bf16.msra.mxu2 %v1681_v2  ;;  %1727 = vmatpush.bf16.msra.mxu3 %v1681_v2  ;;  %v1457_v33 = vor.u32 %v1669_v32, %v1456_v31  ;;  %v1434_v35 = vld [vmem:[%s2304_s25 + $0x18] sm:$0xf0]  ;;  %v1464_v37 = vld [vmem:[%s2304_s25 + $0x50] sm:$0xf]  ;;  %v1671_v38 = vld [vmem:[%s2304_s25 + $0x54] sm:$0xf0]  ;;  %p1972_p1 = pnand %p1971_p4, %p2224_p7 }
  0x62   : > { %v1437_v36 = vor.u32 %v1662_v34, %v1434_v35  ;;  %v1465_v39 = vor.u32 %v1671_v38, %v1464_v37  ;;  %v1664_v40 = vld [vmem:[%s2304_s25 + $0x24] sm:$0xf]  ;;  %v1442_v41 = vld [vmem:[%s2304_s25 + $0x28] sm:$0xf0]  ;;  %v1472_v43 = vld [vmem:[%s2304_s25 + $0x60] sm:$0xf] }
  0x63   : > { %v1445_v42 = vor.u32 %v1664_v40, %v1442_v41  ;;  %v1673_v44 = vld [vmem:[%s2304_s25 + $0x64] sm:$0xf0]  ;;  %v1666_v46 = vld [vmem:[%s2304_s25 + $0x34] sm:$0xf]  ;;  %v1450_v47 = vld [vmem:[%s2304_s25 + $0x38] sm:$0xf0]  ;;  %p1973_p11 = pneg %p1972_p1 }
  0x64   : > { %1728 = vmatpush.bf16.msra.mxu1 %v1680_v3  ;;  %665 = vmatpush.bf16.msra.mxu0 %v1680_v3  ;;  %v1473_v45 = vor.u32 %v1673_v44, %v1472_v43  ;;  %v1453_v48 = vor.u32 %v1666_v46, %v1450_v47  ;;  %v1668_v49 = vld [vmem:[%s2304_s25 + $0x44] sm:$0xf]  ;;  %v1458_v50 = vld [vmem:[%s2304_s25 + $0x48] sm:$0xf0]  ;;  %v1480_v52 = vld [vmem:[%s2304_s25 + $0x70] sm:$0xf] }
  0x65   : > { %1729 = vmatpush.bf16.msra.mxu2 %v1680_v3  ;;  %1730 = vmatpush.bf16.msra.mxu3 %v1680_v3  ;;  %v1461_v51 = vor.u32 %v1668_v49, %v1458_v50  ;;  %v1675_v53 = vld [vmem:[%s2304_s25 + $0x74] sm:$0xf0]  ;;  %v1670_v55 = vld [vmem:[%s2304_s25 + $0x54] sm:$0xf]  ;;  %v1466_v56 = vld [vmem:[%s2304_s25 + $0x58] sm:$0xf0] }
  0x66   : > { %v1481_v54 = vor.u32 %v1675_v53, %v1480_v52  ;;  %v1469_v57 = vor.u32 %v1670_v55, %v1466_v56  ;;  %v1713_v58 = vld [vmem:[#allocation8 + $0xac] sm:$0xf]  ;;  %v1638_v59 = vld [vmem:[#allocation8 + $0xb4] sm:$0xf0]  ;;  %v1636_v60 = vld [vmem:[#allocation8 + $0xa8] sm:$0xf] }
  0x67   : > { %v1641_v61 = vor.u32 %v1713_v58, %v1638_v59  ;;  %v1714_v62 = vld [vmem:[#allocation8 + $0xb0] sm:$0xf0]  ;;  %v1644_v63 = vld [vmem:[#allocation8 + $0xb0] sm:$0xf]  ;;  %v1715_v0 = vld [vmem:[#allocation8 + $0xb8] sm:$0xf0] }
  0x68   : > { %1731 = vmatpush.bf16.msra.mxu1 %v1679_v4  ;;  %666 = vmatpush.bf16.msra.mxu0 %v1679_v4  ;;  %v1637_v1 = vor.u32 %v1714_v62, %v1636_v60  ;;  %v1645_v2 = vor.u32 %v1715_v0, %v1644_v63  ;;  %v1710_v3 = vld [vmem:[#allocation8 + $0x94] sm:$0xf]  ;;  %v1632_v8 = vld [vmem:[#allocation8 + $0x98] sm:$0xf]  ;;  %v1712_v10 = vld [vmem:[#allocation8 + $0xa0] sm:$0xf0] }
  0x69   : > { %1732 = vmatpush.bf16.msra.mxu2 %v1679_v4  ;;  %1733 = vmatpush.bf16.msra.mxu3 %v1679_v4  ;;  %v1626_v4 = vld [vmem:[#allocation8 + $0x9c] sm:$0xf0]  ;;  %v1633_v11 = vor.u32 %v1712_v10, %v1632_v8  ;;  %v1709_v18 = vld [vmem:[#allocation8 + $0x88] sm:$0xf0]  ;;  %v1704_v21 = vld [vmem:[#allocation8 + $0x64] sm:$0xf] }
  0x6a   : > { %v1706_v28 = vld [vmem:[#allocation8 + $0x70] sm:$0xf0]  ;;  %v1672_v29 = vld [vmem:[%s2304_s25 + $0x64] sm:$0xf]  ;;  %v1590_v34 = vld [vmem:[#allocation8 + $0x54] sm:$0xf0] }
  0x6b   : > { %v1588_v35 = vld [vmem:[#allocation8 + $0x48] sm:$0xf]  ;;  %v1702_v38 = vld [vmem:[#allocation8 + $0x50] sm:$0xf0]  ;;  %v1703_v40 = vld [vmem:[#allocation8 + $0x58] sm:$0xf0] }
  0x6c   : > { %1734 = vmatpush.bf16.msra.mxu1 %v1678_v5  ;;  %667 = vmatpush.bf16.msra.mxu0 %v1678_v5  ;;  %v1589_v41 = vor.u32 %v1702_v38, %v1588_v35  ;;  %v1698_v43 = vld [vmem:[#allocation8 + $0x34] sm:$0xf]  ;;  %v1578_v44 = vld [vmem:[#allocation8 + $0x3c] sm:$0xf0]  ;;  %v1699_v47 = vld [vmem:[#allocation8 + $0x38] sm:$0xf0] }
  0x6d   : > { %1735 = vmatpush.bf16.msra.mxu2 %v1678_v5  ;;  %1736 = vmatpush.bf16.msra.mxu3 %v1678_v5  ;;  %v1629_v5 = vor.u32 %v1710_v3, %v1626_v4  ;;  %v1581_v46 = vor.u32 %v1698_v43, %v1578_v44  ;;  %v1700_v49 = vld [vmem:[#allocation8 + $0x40] sm:$0xf0]  ;;  %v1695_v52 = vld [vmem:[#allocation8 + $0x1c] sm:$0xf]  ;;  %v1566_v53 = vld [vmem:[#allocation8 + $0x24] sm:$0xf0] }
  0x6e   : > { %v1569_v56 = vor.u32 %v1695_v52, %v1566_v53  ;;  %v1572_v58 = vld [vmem:[#allocation8 + $0x20] sm:$0xf]  ;;  %v1697_v59 = vld [vmem:[#allocation8 + $0x28] sm:$0xf0]  ;;  %v1674_v62 = vld [vmem:[%s2304_s25 + $0x74] sm:$0xf] }
  0x6f   : > { %v1482_v63 = vld [vmem:[%s2304_s25 + $0x78] sm:$0xf0]  ;;  %v1692_v0 = vld [vmem:[#allocation8 + $0x4] sm:$0xf]  ;;  %v1693_v4 = vld [vmem:[#allocation8 + $0x8] sm:$0xf0] }
  0x70   : > { %1737 = vmatpush.bf16.msra.mxu1 %v1677_v6  ;;  %668 = vmatpush.bf16.msra.mxu0 %v1677_v6  ;;  %v474_v44 = vld [vmem:[%s2315_s16 + $0x20] sm:$0xff] }
  0x71   : > { %1738 = vmatpush.bf16.msra.mxu2 %v1677_v6  ;;  %1739 = vmatpush.bf16.msra.mxu3 %v1677_v6  ;;  %v1624_v6 = vld [vmem:[#allocation8 + $0x90] sm:$0xf] }
  0x74   : > { %1740 = vmatpush.bf16.msra.mxu1 %v1676_v7  ;;  %669 = vmatpush.bf16.msra.mxu0 %v1676_v7 }
  0x75   : > { %1741 = vmatpush.bf16.msra.mxu2 %v1676_v7  ;;  %1742 = vmatpush.bf16.msra.mxu3 %v1676_v7  ;;  %v1711_v7 = vld [vmem:[#allocation8 + $0x98] sm:$0xf0] }
  0x76   : > { %v1625_v9 = vor.u32 %v1711_v7, %v1624_v6  ;;  %v1694_v6 = vld [vmem:[#allocation8 + $0x10] sm:$0xf0] }
  0x77   : > { %680 = vmatmul.bf16.vlgmr.msra.gmra.mxu1 %v1441_v13  ;;  %670 = vmatmul.bf16.vlgmr.msra.gmra.mxu0 %v1425_v14  ;;  %v1614_v13 = vld [vmem:[#allocation8 + $0x84] sm:$0xf0]  ;;  %v1612_v14 = vld [vmem:[#allocation8 + $0x78] sm:$0xf] }
  0x78   : > { %711 = vmatpush.bf16.msrb.mxu1 %v1691_v12  ;;  %690 = vmatmul.bf16.vlgmr.msra.gmra.mxu2 %v1457_v33  ;;  %v1707_v12 = vld [vmem:[#allocation8 + $0x7c] sm:$0xf]  ;;  %v1701_v33 = vld [vmem:[#allocation8 + $0x4c] sm:$0xf] }
  0x79   : > { %700 = vmatmul.bf16.vlgmr.msra.gmra.mxu3 %v1473_v45  ;;  %972 = vmatpush.bf16.msrb.mxu2 %v1637_v1  ;;  %v1593_v37 = vor.u32 %v1701_v33, %v1590_v34  ;;  %v1576_v45 = vld [vmem:[#allocation8 + $0x30] sm:$0xf] }
  0x7a   : > { %1021 = vmatpush.bf16.msrb.mxu3 %v1641_v61  ;;  %1070 = vmatpush.bf16.msrb.mxu0 %v1645_v2  ;;  %v1577_v50 = vor.u32 %v1699_v47, %v1576_v45  ;;  %v1573_v61 = vor.u32 %v1697_v59, %v1572_v58  ;;  %v1554_v1 = vld [vmem:[#allocation8 + $0xc] sm:$0xf0]  ;;  %v1552_v2 = vld [vmem:[#allocation8] sm:$0xf]  ;;  %v475_v47 = vld [vmem:[%s2315_s16 + $0x28] sm:$0xff] }
  0x7b   : > { %v1557_v3 = vor.u32 %v1692_v0, %v1554_v1  ;;  %v1553_v7 = vor.u32 %v1693_v4, %v1552_v2  ;;  %v476_v58 = vld [vmem:[%s2315_s16 + $0x30] sm:$0xff] }
  0x7c   : > { %712 = vmatpush.bf16.msrb.mxu1 %v1690_v15  ;;  %v1617_v15 = vor.u32 %v1707_v12, %v1614_v13  ;;  %v470_v13 = vld [vmem:[%s2315_s16] sm:$0xff] }
  0x7d   : > { %973 = vmatpush.bf16.msrb.mxu2 %v1625_v9  ;;  %v1485_v9 = vor.u32 %v1674_v62, %v1482_v63 }
  0x7e   : > { %1022 = vmatpush.bf16.msrb.mxu3 %v1629_v5  ;;  %1071 = vmatpush.bf16.msrb.mxu0 %v1633_v11  ;;  %v1560_v5 = vld [vmem:[#allocation8 + $0x8] sm:$0xf] }
  0x7f   : > { %v1561_v8 = vor.u32 %v1694_v6, %v1560_v5  ;;  %v478_v5 = vld [vmem:[%s2315_s16 + $0x40] sm:$0xff] }
  0x80   : > { %713 = vmatpush.bf16.msrb.mxu1 %v1689_v16  ;;  %v1708_v16 = vld [vmem:[#allocation8 + $0x80] sm:$0xf0] }
  0x81   : > { %v1613_v19 = vor.u32 %v1708_v16, %v1612_v14 }
  0x82   : > { %1023 = vmatpush.bf16.msrb.mxu3 %v1617_v15 }
  0x83   : > { %974 = vmatpush.bf16.msrb.mxu2 %v1613_v19  ;;  %v2366_v19 = vld [vmem:[%s2623_s3] ss:$0 sm:$0xff] }
  0x84   : > { %714 = vmatpush.bf16.msrb.mxu1 %v1688_v17  ;;  %v1620_v17 = vld [vmem:[#allocation8 + $0x80] sm:$0xf] }
  0x85   : > { %v1621_v20 = vor.u32 %v1709_v18, %v1620_v17  ;;  %v471_v17 = vld [vmem:[%s2315_s16 + $0x8] sm:$0xff] }
  0x87   : > { %685 = vmatmul.bf16.gmra.mxu1 %v1449_v23  ;;  %675 = vmatmul.bf16.gmra.mxu0 %v1433_v24  ;;  %v1600_v24 = vld [vmem:[#allocation8 + $0x60] sm:$0xf] }
  0x88   : > { %715 = vmatpush.bf16.msrb.mxu1 %v1687_v22  ;;  %695 = vmatmul.bf16.gmra.mxu2 %v1465_v39  ;;  %v1602_v22 = vld [vmem:[#allocation8 + $0x6c] sm:$0xf0] }
  0x89   : > { %705 = vmatmul.bf16.gmra.mxu3 %v1481_v54  ;;  %v1605_v23 = vor.u32 %v1704_v21, %v1602_v22  ;;  %1072 = vmatpush.bf16.msrb.mxu0 %v1621_v20  ;;  %v1596_v39 = vld [vmem:[#allocation8 + $0x50] sm:$0xf]  ;;  %v1564_v54 = vld [vmem:[#allocation8 + $0x18] sm:$0xf] }
  0x8b   : > { %1024 = vmatpush.bf16.msrb.mxu3 %v1605_v23 }
  0x8c   : > { %716 = vmatpush.bf16.msrb.mxu1 %v1686_v25  ;;  %v1705_v25 = vld [vmem:[#allocation8 + $0x68] sm:$0xf0] }
  0x8f   : > { %1025 = vmatpush.bf16.msrb.mxu3 %v1593_v37 }
  0x90   : > { %717 = vmatpush.bf16.msrb.mxu1 %v1685_v26  ;;  %v1608_v26 = vld [vmem:[#allocation8 + $0x68] sm:$0xf] }
  0x91   : > { %v1609_v31 = vor.u32 %v1706_v28, %v1608_v26  ;;  %v472_v28 = vld [vmem:[%s2315_s16 + $0x10] sm:$0xff] }
  0x93   : > { %1073 = vmatpush.bf16.msrb.mxu0 %v1609_v31  ;;  %1026 = vmatpush.bf16.msrb.mxu3 %v1581_v46 }
  0x94   : > { %718 = vmatpush.bf16.msrb.mxu1 %v1684_v27  ;;  %v1601_v27 = vor.u32 %v1705_v25, %v1600_v24 }
  0x96   : > { %975 = vmatpush.bf16.msrb.mxu2 %v1601_v27 }
  0x97   : > { %719 = vmatmul.bf16.vlgmr.msrb.gmra.mxu1 %v1429_v30  ;;  %v1474_v30 = vld [vmem:[%s2304_s25 + $0x68] sm:$0xf0]  ;;  %1027 = vmatpush.bf16.msrb.mxu3 %v1569_v56 }
  0x98   : > { %v1477_v32 = vor.u32 %v1672_v29, %v1474_v30 }
  0x9a   : > { %976 = vmatpush.bf16.msrb.mxu2 %v1589_v41 }
  0x9b   : > { %1028 = vmatpush.bf16.msrb.mxu3 %v1557_v3 }
  0x9e   : > { %977 = vmatpush.bf16.msrb.mxu2 %v1577_v50 }
  0xa7   : > { %724 = vmatmul.bf16.gmra.mxu1 %v1437_v36 }
  0xb7   : > { %729 = vmatmul.bf16.gmra.mxu1 %v1445_v42  ;;  %v1597_v42 = vor.u32 %v1703_v40, %v1596_v39 }
  0xb9   : > { %1074 = vmatpush.bf16.msrb.mxu0 %v1597_v42 }
  0xc7   : > { %734 = vmatmul.bf16.gmra.mxu1 %v1453_v48  ;;  %v1584_v48 = vld [vmem:[#allocation8 + $0x38] sm:$0xf] }
  0xd7   : > { %739 = vmatmul.bf16.gmra.mxu1 %v1461_v51  ;;  %v1585_v51 = vor.u32 %v1700_v49, %v1584_v48 }
  0xd9   : > { %1075 = vmatpush.bf16.msrb.mxu0 %v1585_v51 }
  0xdd   : > { %1076 = vmatpush.bf16.msrb.mxu0 %v1573_v61 }
  0xe1   : > { %1077 = vmatpush.bf16.msrb.mxu0 %v1561_v8 }
  0xe7   : > { %744 = vmatmul.bf16.gmra.mxu1 %v1469_v57  ;;  %v1696_v57 = vld [vmem:[#allocation8 + $0x20] sm:$0xf0] }
  0xe8   : > { %v1565_v60 = vor.u32 %v1696_v57, %v1564_v54 }
  0xea   : > { %978 = vmatpush.bf16.msrb.mxu2 %v1565_v60  ;;  %v477_v60 = vld [vmem:[%s2315_s16 + $0x38] sm:$0xff] }
  0xee   : > { %979 = vmatpush.bf16.msrb.mxu2 %v1553_v7 }
  0xf4   : > { %v2355_v36 = vpop.f32.mrf.mxu1  ;;  %v671_v11 = vpop.f32.mrf.mxu0 }
  0xf5   : > { %v672_v16 = vadd.f32 %v671_v11, %v470_v13  ;;  %v682_v46 = vadd.f32 %v2355_v36, %v474_v44 }
  0xf7   : > { %749 = vmatmul.bf16.gmra.mxu1 %v1477_v32  ;;  %v473_v32 = vld [vmem:[%s2315_s16 + $0x18] sm:$0xff] }
  0xfb   : > { %v691_v62 = vpop.f32.mrf.mxu2 }
  0xfc   : > { %v2357_v55 = vpop.f32.mrf.mxu1  ;;  %v673_v14 = vpop.f32.mrf.mxu0 }
  0xfd   : > { %v674_v20 = vadd.f32 %v673_v14, %v471_v17  ;;  %v684_v49 = vadd.f32 %v2357_v55, %v475_v47 }
 0x103   : > { %v693_v7 = vpop.f32.mrf.mxu2 }
 0x104   : > { %v686_v10 = vpop.f32.mrf.mxu1  ;;  %v676_v24 = vpop.f32.mrf.mxu0 }
 0x105   : > { %v677_v31 = vadd.f32 %v676_v24, %v472_v28  ;;  %v687_v36 = vadd.f32 %v686_v10, %v476_v58  ;;  %v479_v10 = vld [vmem:[%s2315_s16 + $0x48] sm:$0xff]  ;;  %v701_v28 = vpop.f32.mrf.mxu3 }
 0x107   : > { %754 = vmatmul.bf16.gmra.mxu1 %v1485_v9  ;;  %v692_v9 = vadd.f32 %v691_v62, %v478_v5 }
 0x10c   : > { %v688_v12 = vpop.f32.mrf.mxu1  ;;  %v678_v33 = vpop.f32.mrf.mxu0 }
 0x10d   : > { %v679_v35 = vadd.f32 %v678_v33, %v473_v32  ;;  %v689_v55 = vadd.f32 %v688_v12, %v477_v60  ;;  %v694_v12 = vadd.f32 %v693_v7, %v479_v10 }
 0x114   : > { %v720_v15 = vpop.f32.mrf.mxu1 }
 0x115   : > { %v721_v18 = vadd.f32 %v720_v15, %v672_v16  ;;  %v696_v16 = vpop.f32.mrf.mxu2 }
 0x117   : > { %v764_v22 = vadd.f32 %v2366_v19, %v721_v18 }
 0x119   : > { %v780_v26 = vmax.f32 %v764_v22, 0.0 }
 0x11c   : > { %v722_v21 = vpop.f32.mrf.mxu1 }
 0x11d   : > { %v723_v23 = vadd.f32 %v722_v21, %v674_v20  ;;  %v480_v21 = vld [vmem:[%s2315_s16 + $0x50] sm:$0xff] }
 0x11e   : > { %v697_v24 = vadd.f32 %v696_v16, %v480_v21 }
 0x11f   : > { %v765_v25 = vadd.f32 %v2366_v19, %v723_v23 }
 0x121   : > { %v781_v27 = vmax.f32 %v765_v25, 0.0  ;;  %v481_v25 = vld [vmem:[%s2315_s16 + $0x58] sm:$0xff] }
 0x123   : > { %v796_v29 = vpack.c.bf16 %v781_v27, %v780_v26  ;;  %v698_v26 = vpop.f32.mrf.mxu2 }
 0x124   : > { %v725_v30 = vpop.f32.mrf.mxu1 }
 0x125   : > { %980 = vmatmul.bf16.vlgmr.msrb.gmra.mxu2 %v796_v29  ;;  %1029 = vmatmul.bf16.vlgmr.msrb.gmra.mxu3 %v796_v29  ;;  %v726_v34 = vadd.f32 %v725_v30, %v677_v31 }
 0x126   : > { %1078 = vmatmul.bf16.vlgmr.msrb.gmra.mxu0 %v796_v29  ;;  %v699_v29 = vadd.f32 %v698_v26, %v481_v25 }
 0x127   : > { %v766_v38 = vadd.f32 %v2366_v19, %v726_v34 }
 0x129   : > { %v782_v41 = vmax.f32 %v766_v38, 0.0 }
 0x12c   : > { %v727_v37 = vpop.f32.mrf.mxu1 }
 0x12d   : > { %v728_v39 = vadd.f32 %v727_v37, %v679_v35  ;;  %v482_v37 = vld [vmem:[%s2315_s16 + $0x60] sm:$0xff] }
 0x12f   : > { %v767_v40 = vadd.f32 %v2366_v19, %v728_v39  ;;  %v703_v39 = vpop.f32.mrf.mxu3 }
 0x131   : > { %v783_v42 = vmax.f32 %v767_v40, 0.0 }
 0x133   : > { %v797_v43 = vpack.c.bf16 %v783_v42, %v782_v41  ;;  %v702_v41 = vadd.f32 %v701_v28, %v482_v37  ;;  %v483_v42 = vld [vmem:[%s2315_s16 + $0x68] sm:$0xff] }
 0x134   : > { %v730_v45 = vpop.f32.mrf.mxu1  ;;  %v704_v44 = vadd.f32 %v703_v39, %v483_v42 }
 0x135   : > { %985 = vmatmul.bf16.gmra.mxu2 %v797_v43  ;;  %1034 = vmatmul.bf16.gmra.mxu3 %v797_v43  ;;  %v731_v48 = vadd.f32 %v730_v45, %v682_v46 }
 0x136   : > { %1083 = vmatmul.bf16.gmra.mxu0 %v797_v43 }
 0x137   : > { %v768_v51 = vadd.f32 %v2366_v19, %v731_v48  ;;  %v706_v48 = vpop.f32.mrf.mxu3 }
 0x139   : > { %v784_v54 = vmax.f32 %v768_v51, 0.0 }
 0x13c   : > { %v732_v50 = vpop.f32.mrf.mxu1 }
 0x13d   : > { %v733_v52 = vadd.f32 %v732_v50, %v684_v49 }
 0x13f   : > { %v769_v53 = vadd.f32 %v2366_v19, %v733_v52  ;;  %v484_v52 = vld [vmem:[%s2315_s16 + $0x70] sm:$0xff]  ;;  %v708_v58 = vpop.f32.mrf.mxu3 }
 0x141   : > { %v785_v56 = vmax.f32 %v769_v53, 0.0 }
 0x143   : > { %v798_v57 = vpack.c.bf16 %v785_v56, %v784_v54  ;;  %v707_v56 = vadd.f32 %v706_v48, %v484_v52 }
 0x144   : > { %v735_v59 = vpop.f32.mrf.mxu1 }
 0x145   : > { %990 = vmatmul.bf16.gmra.mxu2 %v798_v57  ;;  %1039 = vmatmul.bf16.gmra.mxu3 %v798_v57  ;;  %v736_v61 = vadd.f32 %v735_v59, %v687_v36 }
 0x146   : > { %1088 = vmatmul.bf16.gmra.mxu0 %v798_v57  ;;  %v485_v57 = vld [vmem:[%s2315_s16 + $0x78] sm:$0xff]  ;;  %s1223_s16 = scalar_lea.hbm %s2628_s8, %s1716_s17  ;;  %s2544_s17 = scalar_lea.sflag [#allocation11], %s344_s19 }
 0x147   : > { %v770_v0 = vadd.f32 %v2366_v19, %v736_v61  ;;  %v709_v36 = vadd.f32 %v708_v58, %v485_v57  ;;  %s2530_s22 = sshll.u32 %s1223_s16, 4  ;;  %s1227_s22 = int_to_ptr.hbm [resolvable:$true] %s2530_s22 }
 0x149   : > { %v786_v3 = vmax.f32 %v770_v0, 0.0 }
 0x14c   : > { %v737_v63 = vpop.f32.mrf.mxu1 }
 0x14d   : > { %v738_v1 = vadd.f32 %v737_v63, %v689_v55 }
 0x14f   : > { %v771_v2 = vadd.f32 %v2366_v19, %v738_v1 }
 0x151   : > { %v787_v4 = vmax.f32 %v771_v2, 0.0  ;;  %v836_v2 = vld [vmem:[%s2625_s5] sm:$0x7] }
 0x153   : > { %v799_v6 = vpack.c.bf16 %v787_v4, %v786_v3  ;;  %v2403_v3 = vperm.slane %v836_v2, 2 }
 0x154   : > { %v740_v8 = vpop.f32.mrf.mxu1 }
 0x155   : > { %995 = vmatmul.bf16.gmra.mxu2 %v799_v6  ;;  %1044 = vmatmul.bf16.gmra.mxu3 %v799_v6  ;;  %v741_v11 = vadd.f32 %v740_v8, %v692_v9 }
 0x156   : > { %1093 = vmatmul.bf16.gmra.mxu0 %v799_v6  ;;  %v2406_v6 = vperm.slane %v836_v2, 0 }
 0x157   : > { %v772_v14 = vadd.f32 %v2366_v19, %v741_v11 }
 0x159   : > { %v788_v18 = vmax.f32 %v772_v14, 0.0 }
 0x15c   : > { %v742_v13 = vpop.f32.mrf.mxu1 }
 0x15d   : > { %v743_v15 = vadd.f32 %v742_v13, %v694_v12 }
 0x15f   : > { %v773_v17 = vadd.f32 %v2366_v19, %v743_v15 }
 0x161   : > { %v789_v20 = vmax.f32 %v773_v17, 0.0 }
 0x163   : > { %v800_v22 = vpack.c.bf16 %v789_v20, %v788_v18 }
 0x164   : > { %v745_v23 = vpop.f32.mrf.mxu1 }
 0x165   : > { %1000 = vmatmul.bf16.gmra.mxu2 %v800_v22  ;;  %1049 = vmatmul.bf16.gmra.mxu3 %v800_v22  ;;  %v746_v27 = vadd.f32 %v745_v23, %v697_v24 }
 0x166   : > { %1098 = vmatmul.bf16.gmra.mxu0 %v800_v22 }
 0x167   : > { %v774_v31 = vadd.f32 %v2366_v19, %v746_v27 }
 0x169   : > { %v790_v34 = vmax.f32 %v774_v31, 0.0 }
 0x16c   : > { %v747_v30 = vpop.f32.mrf.mxu1 }
 0x16d   : > { %v748_v32 = vadd.f32 %v747_v30, %v699_v29 }
 0x16f   : > { %v775_v33 = vadd.f32 %v2366_v19, %v748_v32 }
 0x171   : > { %v791_v35 = vmax.f32 %v775_v33, 0.0 }
 0x173   : > { %v801_v38 = vpack.c.bf16 %v791_v35, %v790_v34 }
 0x174   : > { %v750_v40 = vpop.f32.mrf.mxu1 }
 0x175   : > { %1005 = vmatmul.bf16.gmra.mxu2 %v801_v38  ;;  %1054 = vmatmul.bf16.gmra.mxu3 %v801_v38  ;;  %v751_v43 = vadd.f32 %v750_v40, %v702_v41 }
 0x176   : > { %1103 = vmatmul.bf16.gmra.mxu0 %v801_v38 }
 0x177   : > { %v776_v46 = vadd.f32 %v2366_v19, %v751_v43 }
 0x179   : > { %v792_v50 = vmax.f32 %v776_v46, 0.0 }
 0x17c   : > { %v752_v45 = vpop.f32.mrf.mxu1 }
 0x17d   : > { %v753_v47 = vadd.f32 %v752_v45, %v704_v44 }
 0x17f   : > { %v777_v49 = vadd.f32 %v2366_v19, %v753_v47 }
 0x181   : > { %v793_v51 = vmax.f32 %v777_v49, 0.0 }
 0x183   : > { %v802_v53 = vpack.c.bf16 %v793_v51, %v792_v50 }
 0x184   : > { %v755_v54 = vpop.f32.mrf.mxu1 }
 0x185   : > { %1010 = vmatmul.bf16.gmra.mxu2 %v802_v53  ;;  %1059 = vmatmul.bf16.gmra.mxu3 %v802_v53  ;;  %v756_v59 = vadd.f32 %v755_v54, %v707_v56 }
 0x186   : > { %1108 = vmatmul.bf16.gmra.mxu0 %v802_v53 }
 0x187   : > { %v778_v61 = vadd.f32 %v2366_v19, %v756_v59 }
 0x189   : > { %v794_v63 = vmax.f32 %v778_v61, 0.0 }
 0x18c   : > { %v757_v60 = vpop.f32.mrf.mxu1 }
 0x18d   : > { %v758_v62 = vadd.f32 %v757_v60, %v709_v36 }
 0x18f   : > { %v779_v55 = vadd.f32 %v2366_v19, %v758_v62  ;;  %v2408_v19 = vperm.slane %v836_v2, 1 }
 0x191   : > { %v795_v0 = vmax.f32 %v779_v55, 0.0 }
 0x193   : > { %v803_v1 = vpack.c.bf16 %v795_v0, %v794_v63 }
 0x195   : > { %1015 = vmatmul.bf16.gmra.mxu2 %v803_v1  ;;  %1064 = vmatmul.bf16.gmra.mxu3 %v803_v1 }
 0x196   : > { %1113 = vmatmul.bf16.gmra.mxu0 %v803_v1 }
 0x1a3   : > { %v1079_v4 = vpop.f32.mrf.mxu0 }
 0x1a4   : > { %v1080_v5 = vadd.f32 %v1079_v4, %v2403_v3 }
 0x1a6   : > { %1151 = vst [vmem:[%s2411_s23] sm:$0xff] %v1080_v5 }
 0x1a8   : > { %v981_v7 = vpop.f32.mrf.mxu2  ;;  %v1030_v8 = vpop.f32.mrf.mxu3 }
 0x1a9   : > { %v982_v9 = vadd.f32 %v981_v7, %v2406_v6  ;;  %v1031_v10 = vadd.f32 %v1030_v8, %v2408_v19 }
 0x1ab   : > { %1119 = vst [vmem:[%s2417_s10] sm:$0xff] %v982_v9  ;;  %v1081_v11 = vpop.f32.mrf.mxu0 }
 0x1ac   : > { %1135 = vst [vmem:[%s2421_s24] sm:$0xff] %v1031_v10  ;;  %v1082_v12 = vadd.f32 %v1081_v11, %v2403_v3 }
 0x1ae   : > { %1152 = vst [vmem:[%s2411_s23 + $0x8] sm:$0xff] %v1082_v12 }
 0x1b0   : > { %v983_v13 = vpop.f32.mrf.mxu2  ;;  %v1032_v14 = vpop.f32.mrf.mxu3 }
 0x1b1   : > { %v984_v15 = vadd.f32 %v983_v13, %v2406_v6  ;;  %v1033_v16 = vadd.f32 %v1032_v14, %v2408_v19 }
 0x1b3   : > { %1120 = vst [vmem:[%s2417_s10 + $0x8] sm:$0xff] %v984_v15  ;;  %v1084_v17 = vpop.f32.mrf.mxu0 }
 0x1b4   : > { %1136 = vst [vmem:[%s2421_s24 + $0x8] sm:$0xff] %v1033_v16  ;;  %v1085_v18 = vadd.f32 %v1084_v17, %v2403_v3 }
 0x1b6   : > { %1153 = vst [vmem:[%s2411_s23 + $0x10] sm:$0xff] %v1085_v18 }
 0x1b8   : > { %v986_v20 = vpop.f32.mrf.mxu2  ;;  %v1035_v21 = vpop.f32.mrf.mxu3 }
 0x1b9   : > { %v987_v22 = vadd.f32 %v986_v20, %v2406_v6  ;;  %v1036_v23 = vadd.f32 %v1035_v21, %v2408_v19 }
 0x1bb   : > { %1121 = vst [vmem:[%s2417_s10 + $0x10] sm:$0xff] %v987_v22  ;;  %v1086_v24 = vpop.f32.mrf.mxu0 }
 0x1bc   : > { %1137 = vst [vmem:[%s2421_s24 + $0x10] sm:$0xff] %v1036_v23  ;;  %v1087_v25 = vadd.f32 %v1086_v24, %v2403_v3 }
 0x1be   : > { %1154 = vst [vmem:[%s2411_s23 + $0x18] sm:$0xff] %v1087_v25 }
 0x1c0   : > { %v988_v26 = vpop.f32.mrf.mxu2  ;;  %v1037_v27 = vpop.f32.mrf.mxu3 }
 0x1c1   : > { %v989_v28 = vadd.f32 %v988_v26, %v2406_v6  ;;  %v1038_v29 = vadd.f32 %v1037_v27, %v2408_v19 }
 0x1c3   : > { %1122 = vst [vmem:[%s2417_s10 + $0x18] sm:$0xff] %v989_v28  ;;  %v1089_v30 = vpop.f32.mrf.mxu0 }
 0x1c4   : > { %1138 = vst [vmem:[%s2421_s24 + $0x18] sm:$0xff] %v1038_v29  ;;  %v1090_v31 = vadd.f32 %v1089_v30, %v2403_v3 }
 0x1c6   : > { %1155 = vst [vmem:[%s2411_s23 + $0x20] sm:$0xff] %v1090_v31 }
 0x1c8   : > { %v991_v32 = vpop.f32.mrf.mxu2  ;;  %v1040_v33 = vpop.f32.mrf.mxu3 }
 0x1c9   : > { %v992_v34 = vadd.f32 %v991_v32, %v2406_v6  ;;  %v1041_v35 = vadd.f32 %v1040_v33, %v2408_v19 }
 0x1cb   : > { %1123 = vst [vmem:[%s2417_s10 + $0x20] sm:$0xff] %v992_v34  ;;  %v1091_v37 = vpop.f32.mrf.mxu0 }
 0x1cc   : > { %1139 = vst [vmem:[%s2421_s24 + $0x20] sm:$0xff] %v1041_v35  ;;  %v1092_v38 = vadd.f32 %v1091_v37, %v2403_v3 }
 0x1ce   : > { %1156 = vst [vmem:[%s2411_s23 + $0x28] sm:$0xff] %v1092_v38 }
 0x1d0   : > { %v993_v39 = vpop.f32.mrf.mxu2  ;;  %v1042_v40 = vpop.f32.mrf.mxu3 }
 0x1d1   : > { %v994_v41 = vadd.f32 %v993_v39, %v2406_v6  ;;  %v1043_v42 = vadd.f32 %v1042_v40, %v2408_v19 }
 0x1d3   : > { %1124 = vst [vmem:[%s2417_s10 + $0x28] sm:$0xff] %v994_v41  ;;  %v1094_v43 = vpop.f32.mrf.mxu0 }
 0x1d4   : > { %1140 = vst [vmem:[%s2421_s24 + $0x28] sm:$0xff] %v1043_v42  ;;  %v1095_v44 = vadd.f32 %v1094_v43, %v2403_v3 }
 0x1d6   : > { %1157 = vst [vmem:[%s2411_s23 + $0x30] sm:$0xff] %v1095_v44 }
 0x1d8   : > { %v996_v45 = vpop.f32.mrf.mxu2  ;;  %v1045_v46 = vpop.f32.mrf.mxu3 }
 0x1d9   : > { %v997_v47 = vadd.f32 %v996_v45, %v2406_v6  ;;  %v1046_v48 = vadd.f32 %v1045_v46, %v2408_v19 }
 0x1db   : > { %1125 = vst [vmem:[%s2417_s10 + $0x30] sm:$0xff] %v997_v47  ;;  %v1096_v49 = vpop.f32.mrf.mxu0 }
 0x1dc   : > { %1141 = vst [vmem:[%s2421_s24 + $0x30] sm:$0xff] %v1046_v48  ;;  %v1097_v50 = vadd.f32 %v1096_v49, %v2403_v3 }
 0x1de   : > { %1158 = vst [vmem:[%s2411_s23 + $0x38] sm:$0xff] %v1097_v50 }
 0x1e0   : > { %v998_v51 = vpop.f32.mrf.mxu2  ;;  %v1047_v52 = vpop.f32.mrf.mxu3 }
 0x1e1   : > { %v999_v53 = vadd.f32 %v998_v51, %v2406_v6  ;;  %v1048_v54 = vadd.f32 %v1047_v52, %v2408_v19 }
 0x1e3   : > { %1126 = vst [vmem:[%s2417_s10 + $0x38] sm:$0xff] %v999_v53  ;;  %v1099_v56 = vpop.f32.mrf.mxu0 }
 0x1e4   : > { %1142 = vst [vmem:[%s2421_s24 + $0x38] sm:$0xff] %v1048_v54  ;;  %v1100_v57 = vadd.f32 %v1099_v56, %v2403_v3 }
 0x1e6   : > { %1159 = vst [vmem:[%s2411_s23 + $0x40] sm:$0xff] %v1100_v57 }
 0x1e8   : > { %v1001_v58 = vpop.f32.mrf.mxu2  ;;  %v1050_v59 = vpop.f32.mrf.mxu3 }
 0x1e9   : > { %v1002_v36 = vadd.f32 %v1001_v58, %v2406_v6  ;;  %v1051_v60 = vadd.f32 %v1050_v59, %v2408_v19 }
 0x1eb   : > { %1127 = vst [vmem:[%s2417_s10 + $0x40] sm:$0xff] %v1002_v36  ;;  %v1101_v61 = vpop.f32.mrf.mxu0 }
 0x1ec   : > { %1143 = vst [vmem:[%s2421_s24 + $0x40] sm:$0xff] %v1051_v60  ;;  %v1102_v62 = vadd.f32 %v1101_v61, %v2403_v3 }
 0x1ee   : > { %1160 = vst [vmem:[%s2411_s23 + $0x48] sm:$0xff] %v1102_v62 }
 0x1f0   : > { %v1003_v55 = vpop.f32.mrf.mxu2  ;;  %v1052_v63 = vpop.f32.mrf.mxu3 }
 0x1f1   : > { %v1004_v0 = vadd.f32 %v1003_v55, %v2406_v6  ;;  %v1053_v1 = vadd.f32 %v1052_v63, %v2408_v19 }
 0x1f3   : > { %1128 = vst [vmem:[%s2417_s10 + $0x48] sm:$0xff] %v1004_v0  ;;  %v1104_v2 = vpop.f32.mrf.mxu0 }
 0x1f4   : > { %1144 = vst [vmem:[%s2421_s24 + $0x48] sm:$0xff] %v1053_v1  ;;  %v1105_v4 = vadd.f32 %v1104_v2, %v2403_v3 }
 0x1f6   : > { %1161 = vst [vmem:[%s2411_s23 + $0x50] sm:$0xff] %v1105_v4 }
 0x1f8   : > { %v1006_v5 = vpop.f32.mrf.mxu2  ;;  %v1055_v7 = vpop.f32.mrf.mxu3 }
 0x1f9   : > { %v1007_v8 = vadd.f32 %v1006_v5, %v2406_v6  ;;  %v1056_v9 = vadd.f32 %v1055_v7, %v2408_v19 }
 0x1fb   : > { %1129 = vst [vmem:[%s2417_s10 + $0x50] sm:$0xff] %v1007_v8  ;;  %v1106_v10 = vpop.f32.mrf.mxu0 }
 0x1fc   : > { %1145 = vst [vmem:[%s2421_s24 + $0x50] sm:$0xff] %v1056_v9  ;;  %v1107_v11 = vadd.f32 %v1106_v10, %v2403_v3 }
 0x1fe   : > { %1162 = vst [vmem:[%s2411_s23 + $0x58] sm:$0xff] %v1107_v11 }
 0x200   : > { %v1008_v12 = vpop.f32.mrf.mxu2  ;;  %v1057_v13 = vpop.f32.mrf.mxu3 }
 0x201   : > { %v1009_v14 = vadd.f32 %v1008_v12, %v2406_v6  ;;  %v1058_v15 = vadd.f32 %v1057_v13, %v2408_v19 }
 0x203   : > { %1130 = vst [vmem:[%s2417_s10 + $0x58] sm:$0xff] %v1009_v14  ;;  %v1109_v16 = vpop.f32.mrf.mxu0 }
 0x204   : > { %1146 = vst [vmem:[%s2421_s24 + $0x58] sm:$0xff] %v1058_v15  ;;  %v1110_v17 = vadd.f32 %v1109_v16, %v2403_v3 }
 0x206   : > { %1163 = vst [vmem:[%s2411_s23 + $0x60] sm:$0xff] %v1110_v17 }
 0x208   : > { %v1011_v18 = vpop.f32.mrf.mxu2  ;;  %v1060_v20 = vpop.f32.mrf.mxu3 }
 0x209   : > { %v1012_v21 = vadd.f32 %v1011_v18, %v2406_v6  ;;  %v1061_v22 = vadd.f32 %v1060_v20, %v2408_v19 }
 0x20b   : > { %1131 = vst [vmem:[%s2417_s10 + $0x60] sm:$0xff] %v1012_v21  ;;  %v1111_v23 = vpop.f32.mrf.mxu0 }
 0x20c   : > { %1147 = vst [vmem:[%s2421_s24 + $0x60] sm:$0xff] %v1061_v22  ;;  %v1112_v24 = vadd.f32 %v1111_v23, %v2403_v3 }
 0x20e   : > { %1164 = vst [vmem:[%s2411_s23 + $0x68] sm:$0xff] %v1112_v24 }
 0x210   : > { %v1013_v25 = vpop.f32.mrf.mxu2  ;;  %v1062_v26 = vpop.f32.mrf.mxu3 }
 0x211   : > { %v1014_v27 = vadd.f32 %v1013_v25, %v2406_v6  ;;  %v1063_v28 = vadd.f32 %v1062_v26, %v2408_v19 }
 0x213   : > { %1132 = vst [vmem:[%s2417_s10 + $0x68] sm:$0xff] %v1014_v27  ;;  %v1114_v29 = vpop.f32.mrf.mxu0 }
 0x214   : > { %1148 = vst [vmem:[%s2421_s24 + $0x68] sm:$0xff] %v1063_v28  ;;  %v1115_v30 = vadd.f32 %v1114_v29, %v2403_v3 }
 0x216   : > { %1165 = vst [vmem:[%s2411_s23 + $0x70] sm:$0xff] %v1115_v30 }
 0x218   : > { %v1016_v31 = vpop.f32.mrf.mxu2  ;;  %v1065_v32 = vpop.f32.mrf.mxu3 }
 0x219   : > { %v1017_v33 = vadd.f32 %v1016_v31, %v2406_v6  ;;  %v1066_v34 = vadd.f32 %v1065_v32, %v2408_v19 }
 0x21b   : > { %1133 = vst [vmem:[%s2417_s10 + $0x70] sm:$0xff] %v1017_v33  ;;  %v1116_v35 = vpop.f32.mrf.mxu0 }
 0x21c   : > { %1149 = vst [vmem:[%s2421_s24 + $0x70] sm:$0xff] %v1066_v34  ;;  %v1117_v37 = vadd.f32 %v1116_v35, %v2403_v3 }
 0x21e   : > { %1166 = vst [vmem:[%s2411_s23 + $0x78] sm:$0xff] %v1117_v37 }
 0x220   : > { %v1018_v38 = vpop.f32.mrf.mxu2  ;;  %v1067_v3 = vpop.f32.mrf.mxu3 }
 0x221   : > { %v1019_v39 = vadd.f32 %v1018_v38, %v2406_v6  ;;  %v1068_v40 = vadd.f32 %v1067_v3, %v2408_v19 }
 0x223   : > { %1134 = vst [vmem:[%s2417_s10 + $0x78] sm:$0xff] %v1019_v39  ;;  %s1974_s10 = scalar_lea.hbm %s2627_s7, 256 }
 0x224   : > { %1150 = vst [vmem:[%s2421_s24 + $0x78] sm:$0xff] %v1068_v40  ;;  %p1976_p13 = scmp.lt.s32.totalorder %s1974_s10, %s1970_s15 }
 0x226   : > { %p1977_p0 = por %p1976_p13, %p1975_p9 }
 0x228   : > { %p1978_p3 = pnand %p1977_p0, %p1973_p11 }
 0x22a   : > { %1981 = shalt.err (!%p1978_p3)
}
 0x22b   : > { %s2102_s9 = smov 128   ;;  %s2103_s19 = smov 8  }
 0x22c   : > { %1756 = dma.vmem_to_hbm [thread:$0]  (%p2224_p7), %s2523_s0, 2048, %s1210_s12, %s2544_s17, %s2102_s9, %s2102_s9, %s2103_s19  }
 0x22d   : > { %s1168_s24 = scalar_lea.sflag [#allocation4], %s346_s26  ;;  %s1996_s1 = sshra.s32 %s1193_s20, 4  ;;  %s1997_s1 = int_to_ptr.hbm [resolvable:$true] %s1996_s1 }
 0x22e   : > { %s1998_s25 = scalar_lea.hbm %s1997_s1, 128  ;;  %s2002_s15 = scalar_lea.hbm %s2626_s6, 256 }
 0x22f   : > { %p1999_p5 = scmp.ne.s32.totalorder %s1997_s1, %s1998_s25  ;;  %p2003_p2 = scmp.lt.s32.totalorder %s1997_s1, %s2626_s6 }
 0x230   : > { %p2004_p12 = scmp.lt.s32.totalorder %s2002_s15, %s1998_s25 }
 0x231   : > { %p2000_p8 = pnand %p1999_p5, %p2224_p7 }
 0x232   : > { %p2005_p4 = por %p2004_p12, %p2003_p2 }
 0x233   : > { %p2001_p10 = pneg %p2000_p8 }
 0x235   : > { %p2006_p1 = pnand %p2005_p4, %p2001_p10 }
 0x237   : > { %2009 = shalt.err (!%p2006_p1)
}
 0x238   : > { %1755 = dma.vmem_to_hbm [thread:$0]  (%p2224_p7), %s2535_s11, 2048, %s1193_s20, %s1168_s24, %s2102_s9, %s2102_s9, %s2103_s19  }
 0x239   : > { %s2024_s26 = sshra.s32 %s1227_s22, 4  ;;  %s2030_s27 = scalar_lea.hbm %s2628_s8, 256  ;;  %s2025_s26 = int_to_ptr.hbm [resolvable:$true] %s2024_s26 }
 0x23a   : > { %s2026_s0 = scalar_lea.hbm %s2025_s26, 128  ;;  %p2031_p0 = scmp.lt.s32.totalorder %s2025_s26, %s2628_s8 }
 0x23b   : > { %p2027_p11 = scmp.ne.s32.totalorder %s2025_s26, %s2026_s0  ;;  %p2032_p3 = scmp.lt.s32.totalorder %s2030_s27, %s2026_s0 }
 0x23d   : > { %p2028_p9 = pnand %p2027_p11, %p2224_p7  ;;  %p2033_p5 = por %p2032_p3, %p2031_p0 }
 0x23f   : > { %p2029_p13 = pneg %p2028_p9 }
 0x241   : > { %p2034_p8 = pnand %p2033_p5, %p2029_p13 }
 0x243   : > { %2037 = shalt.err (!%p2034_p8)
}
 0x244   : > { %1757 = dma.vmem_to_hbm [thread:$0]  (%p2224_p7), %s2540_s18, 2048, %s1227_s22, %s2544_s17, %s2102_s9, %s2102_s9, %s2103_s19  }
 0x245 PF: > { %s2663_s11 = sld [smem:[#allocation19_spill]]  ;;  %p2665_p10 = scmp.ge.s32.totalorder %s2092_s30, 2 }
 0x247   : > { %p1776_p2 = pnand %p2665_p10, %p2186_p6 }
 0x249   : > { %p1777_p12 = pneg %p1776_p2 }
 0x24b   : > { %s1241_s24 = sand.u32 1, %s2663_s11  }
 0x24c   : > { %s1242_s25 = scalar_lea.sflag [#allocation4], %s1241_s24 }
 0x24d   : > { %2071 = dma.done.wait (%p1777_p12), %s1242_s25, 2048  }
 0x24e   : > { %2073 = vsyncadd (%p1777_p12), %s1242_s25, 4294965248  ;;  %s2666_s14 = sadd.s32 4294967294, %s2092_s30  }
 0x24f   : > { %s1251_s16 = sand.u32 1, %s2666_s14  }
 0x250   : > { %s1252_s21 = scalar_lea.sflag [#allocation11], %s1251_s16 }
 0x251   : > { %2075 = dma.done.wait (%p1777_p12), %s1252_s21, 4096  }
 0x252   : > { %2077 = vsyncadd (%p1777_p12), %s1252_s21, 4294963200  ;;  %s2667_s30 = sld [smem:[#allocation22_spill]]  ;;  %s2670_s27 = smov %s2084_s28 }
 0x253   : > { %s2668_s22 = sld [smem:[#allocation20_spill]] }
 0x254   : > { %s2669_s29 = sld [smem:[#allocation23_spill]] }
 0x258   : > { %p26_p7 = scmp.ge.s32.totalorder %s2667_s30, 4  }
 0x259   : > { %s2671_s28 = smov %s2668_s22 }
 0x25a   :  { %28 = sbr.rel (!%p26_p7) target bundleno = 11 (0xb), region = 140 }
 0x25f   :  { %1268 = vsyncpa [#allocation3], 1 }
 0x260   :  { %1270 = vsyncpa [#allocation3 + $0x1], 1 }
 0x261   :  { %1271 = vsyncpa [#allocation6], 1 }
 0x262   :  { %1272 = vsyncpa [#allocation4], 1 }
 0x263   :  { %1274 = vsyncpa [#allocation4 + $0x1], 1 }
 0x264   :  { %1275 = vsyncpa [#allocation11], 1 }
 0x265   :  { %1277 = vsyncpa [#allocation11 + $0x1], 1 }

</bundles_post_ra>
